<compile_context>
chip_gen: v5e
topology: v5e:2x2
jax: 0.10.0
libtpu: 0.0.40
codegen_flags: <defaults>
</compile_context>

<pallas_src>
import functools

import jax
import jax.numpy as jnp
import numpy as np
from jax.experimental import pallas as pl
from jax.experimental.pallas import tpu as pltpu

SOS_token = 0
EOS_token = 1


def _decoder_kernel(zc_ref, w1_ref, b1_ref, a_ref, wh_ref, bg_ref,
                    wfc_ref, bfc_ref, out_ref, *, max_length, latent_size, vocab_size):
    H = latent_size
    V = vocab_size
    ids = jax.lax.broadcasted_iota(jnp.int32, (1, V), 1)

    # Hoist loop-invariant weights once.  Leading-dim indexing is a pure sublane
    # offset (no lane movement); per-gate blocks are already lane-aligned at 0..H-1.
    a_i, a_f, a_g, a_o = a_ref[0], a_ref[1], a_ref[2], a_ref[3]      # each (V, H)
    w_i, w_f, w_g, w_o = wh_ref[0], wh_ref[1], wh_ref[2], wh_ref[3]  # each (H, H)
    b_i, b_f, b_g, b_o = bg_ref[0], bg_ref[1], bg_ref[2], bg_ref[3]  # each (1, H)
    wfc = wfc_ref[...]                                               # (H, V)
    bfc = bfc_ref[...]                                               # (1, V)

    # hidden = l1(cat(z, c)); cell state starts at zero.
    hidden = (jnp.dot(zc_ref[...], w1_ref[...],
                      preferred_element_type=jnp.float32) + b1_ref[...])   # (1, H)
    cur = jnp.zeros_like(hidden)
    # Carry the greedy token as a one-hot row vector (SOS to start).
    one_hot = (ids == SOS_token).astype(jnp.float32)                       # (1, V)

    def gate(a_w, h_w, b):
        # Two independent M=1 MXU pushes + VPU add; result lane-aligned at 0..H-1.
        return (jnp.dot(one_hot, a_w, preferred_element_type=jnp.float32)
                + jnp.dot(hidden, h_w, preferred_element_type=jnp.float32)
                + b)

    rows = []
    # Static trip count -> trace-time unroll; step index is concrete everywhere.
    for _ in range(max_length):
        i_g = jax.nn.sigmoid(gate(a_i, w_i, b_i))
        f_g = jax.nn.sigmoid(gate(a_f, w_f, b_f))
        g_g = jnp.tanh(gate(a_g, w_g, b_g))
        o_g = jax.nn.sigmoid(gate(a_o, w_o, b_o))

        cur = f_g * cur + i_g * g_g
        hidden = o_g * jnp.tanh(cur)

        # fc projection to vocab.
        logits = (jnp.dot(hidden, wfc, preferred_element_type=jnp.float32) + bfc)  # (1, V)
        rows.append(logits)

        # Greedy next token, fully in the vector domain: argmax with ties broken to the
        # smallest index (torch.topk behavior) -> one-hot.  All-NaN logits give a zero
        # one-hot (zero next "embedding"), never an out-of-bounds gather.
        mx = jnp.max(logits, axis=-1, keepdims=True)
        win = jnp.min(jnp.where(logits == mx, ids, jnp.int32(V)),
                      axis=-1, keepdims=True)
        one_hot = (ids == win).astype(jnp.float32)

    # Single static full-block store (replaces per-step masked row stores).
    out_ref[...] = jnp.concatenate(rows, axis=0)
    # TODO(synk): PyTorch breaks the loop when EOS_token is produced (dynamic output
    # length); Pallas outputs are static so we always emit MAX_LENGTH steps.


def decoder_forward(z, c, params, max_length):
    """z: (linear_size,), c: (condition_size,). Returns (MAX_LENGTH, 1, output_size)."""
    latent_size = params["w1"].shape[1]
    output_size = params["wfc"].shape[1]

    zc = jnp.concatenate([z.reshape(1, -1), c.reshape(1, -1)], axis=-1)

    # Fold embedding-lookup + ReLU into the input-gate weights: A = relu(emb) @ wih.
    # Split gate columns into leading-dim stacks so each gate is lane-aligned in-kernel.
    emb_relu = jnp.maximum(params["emb"], 0.0)                       # (V, H)

    def split_gates(m):                                              # (.., 4H) -> (4, .., H)
        return jnp.stack(jnp.split(m, 4, axis=-1), axis=0)

    a_gates = split_gates(emb_relu @ params["wih"])                  # (4, V, H)  [i,f,g,o]
    wh_gates = split_gates(params["whh"])                            # (4, H, H)
    b_gates = split_gates(params["bih"] + params["bhh"])             # (4, 1, H)

    kernel = functools.partial(_decoder_kernel,
                               max_length=max_length,
                               latent_size=latent_size,
                               vocab_size=output_size)
    vmem = pl.BlockSpec(memory_space=pltpu.MemorySpace.VMEM)

    out = pl.pallas_call(
        kernel,
        out_shape=jax.ShapeDtypeStruct((max_length, output_size), jnp.float32),
        in_specs=[vmem] * 8,
        out_specs=vmem,
    )(zc,
      params["w1"], params["b1"],
      a_gates, wh_gates, b_gates,
      params["wfc"], params["bfc"])

    # TODO(synk): for real throughput, batch B independent decodes into the row dim
    # (128 rows v5e / 256 rows v6e+v7x, with a "parallel" batch grid axis for v7x's two
    # TensorCores and bf16 MXU operands on v6e/v7x); the module spec is B=1.
    return out.reshape(max_length, 1, output_size)


def _reference_forward(z, c, params, max_length):
    """Pure-JAX reference of the same greedy decode, using the original (un-fused,
    PyTorch gate order [i,f,g,o]) parameters."""
    H = params["w1"].shape[1]
    zc = jnp.concatenate([z.reshape(1, -1), c.reshape(1, -1)], axis=-1)
    hidden = zc @ params["w1"] + params["b1"]
    cur = jnp.zeros_like(hidden)
    tok = SOS_token
    outs = []
    for _ in range(max_length):
        x = jnp.maximum(params["emb"][tok][None, :], 0.0)
        gates = x @ params["wih"] + params["bih"] + hidden @ params["whh"] + params["bhh"]
        i_g = jax.nn.sigmoid(gates[:, 0:H])
        f_g = jax.nn.sigmoid(gates[:, H:2 * H])
        g_g = jnp.tanh(gates[:, 2 * H:3 * H])
        o_g = jax.nn.sigmoid(gates[:, 3 * H:4 * H])
        cur = f_g * cur + i_g * g_g
        hidden = o_g * jnp.tanh(cur)
        logits = hidden @ params["wfc"] + params["bfc"]
        outs.append(logits)
        tok = int(jnp.argmax(logits[0]))
    return jnp.stack(outs)  # (L, 1, V)


def init_params(key, latent_size, output_size, condition_size, linear_size):
    ks = jax.random.split(key, 9)
    s = 0.1
    return {
        # l1: Linear(linear_size + condition_size -> latent_size), stored transposed
        "w1": s * jax.random.normal(ks[0], (linear_size + condition_size, latent_size), jnp.float32),
        "b1": s * jax.random.normal(ks[1], (1, latent_size), jnp.float32),
        # embedding table (output_size, latent_size)
        "emb": s * jax.random.normal(ks[2], (output_size, latent_size), jnp.float32),
        # LSTM weights, stored transposed: (H, 4H), biases (1, 4H), PyTorch order [i,f,g,o]
        "wih": s * jax.random.normal(ks[3], (latent_size, 4 * latent_size), jnp.float32),
        "bih": s * jax.random.normal(ks[4], (1, 4 * latent_size), jnp.float32),
        "whh": s * jax.random.normal(ks[5], (latent_size, 4 * latent_size), jnp.float32),
        "bhh": s * jax.random.normal(ks[6], (1, 4 * latent_size), jnp.float32),
        # fc: Linear(latent_size -> output_size), stored transposed
        "wfc": s * jax.random.normal(ks[7], (latent_size, output_size), jnp.float32),
        "bfc": s * jax.random.normal(ks[8], (1, output_size), jnp.float32),
    }


if __name__ == "__main__":
    latent_size = 32
    output_size = 32
    condition_size = 8
    linear_size = 32
    MAX_LENGTH = 8

    key = jax.random.PRNGKey(0)
    kp, kz, kc = jax.random.split(key, 3)

    params = init_params(kp, latent_size, output_size, condition_size, linear_size)
    z = jax.random.normal(kz, (linear_size,), jnp.float32)
    c = jax.random.normal(kc, (condition_size,), jnp.float32)

    out = decoder_forward(z, c, params, MAX_LENGTH)
    out = jax.block_until_ready(out)

    ref = _reference_forward(z, c, params, MAX_LENGTH)
    assert out.shape == (MAX_LENGTH, 1, output_size)
    np.testing.assert_allclose(np.asarray(out), np.asarray(ref), rtol=1e-4, atol=1e-4)

    print("KERNEL_OK")
</pallas_src>

<mosaic_0001>
module attributes {stable_mosaic.version = 11 : i64} {
  func.func @_decoder_kernel(%arg0: memref<1x40xf32, #tpu.memory_space<vmem>>, %arg1: memref<40x32xf32, #tpu.memory_space<vmem>>, %arg2: memref<1x32xf32, #tpu.memory_space<vmem>>, %arg3: memref<4x32x32xf32, #tpu.memory_space<vmem>>, %arg4: memref<4x32x32xf32, #tpu.memory_space<vmem>>, %arg5: memref<4x1x32xf32, #tpu.memory_space<vmem>>, %arg6: memref<32x32xf32, #tpu.memory_space<vmem>>, %arg7: memref<1x32xf32, #tpu.memory_space<vmem>>, %arg8: memref<8x32xf32, #tpu.memory_space<vmem>>) attributes {dimension_semantics = [], scalar_prefetch = 0 : i64, scratch_operands = 0 : i64, tpu.core_type = #tpu.core_type<tc>} {
    %0 = tpu.iota {dimensions = array<i32: 1>} : vector<1x32xi32>
    %c0 = arith.constant 0 : index
    %c0_0 = arith.constant 0 : index
    %c0_1 = arith.constant 0 : index
    %1 = vector.load %arg3[%c0, %c0_0, %c0_1] : memref<4x32x32xf32, #tpu.memory_space<vmem>>, vector<1x32x32xf32>
    %2 = vector.shape_cast %1 : vector<1x32x32xf32> to vector<32x32xf32>
    %c1 = arith.constant 1 : index
    %c0_2 = arith.constant 0 : index
    %c0_3 = arith.constant 0 : index
    %3 = vector.load %arg3[%c1, %c0_2, %c0_3] : memref<4x32x32xf32, #tpu.memory_space<vmem>>, vector<1x32x32xf32>
    %4 = vector.shape_cast %3 : vector<1x32x32xf32> to vector<32x32xf32>
    %c2 = arith.constant 2 : index
    %c0_4 = arith.constant 0 : index
    %c0_5 = arith.constant 0 : index
    %5 = vector.load %arg3[%c2, %c0_4, %c0_5] : memref<4x32x32xf32, #tpu.memory_space<vmem>>, vector<1x32x32xf32>
    %6 = vector.shape_cast %5 : vector<1x32x32xf32> to vector<32x32xf32>
    %c3 = arith.constant 3 : index
    %c0_6 = arith.constant 0 : index
    %c0_7 = arith.constant 0 : index
    %7 = vector.load %arg3[%c3, %c0_6, %c0_7] : memref<4x32x32xf32, #tpu.memory_space<vmem>>, vector<1x32x32xf32>
    %8 = vector.shape_cast %7 : vector<1x32x32xf32> to vector<32x32xf32>
    %c0_8 = arith.constant 0 : index
    %c0_9 = arith.constant 0 : index
    %c0_10 = arith.constant 0 : index
    %9 = vector.load %arg4[%c0_8, %c0_9, %c0_10] : memref<4x32x32xf32, #tpu.memory_space<vmem>>, vector<1x32x32xf32>
    %10 = vector.shape_cast %9 : vector<1x32x32xf32> to vector<32x32xf32>
    %c1_11 = arith.constant 1 : index
    %c0_12 = arith.constant 0 : index
    %c0_13 = arith.constant 0 : index
    %11 = vector.load %arg4[%c1_11, %c0_12, %c0_13] : memref<4x32x32xf32, #tpu.memory_space<vmem>>, vector<1x32x32xf32>
    %12 = vector.shape_cast %11 : vector<1x32x32xf32> to vector<32x32xf32>
    %c2_14 = arith.constant 2 : index
    %c0_15 = arith.constant 0 : index
    %c0_16 = arith.constant 0 : index
    %13 = vector.load %arg4[%c2_14, %c0_15, %c0_16] : memref<4x32x32xf32, #tpu.memory_space<vmem>>, vector<1x32x32xf32>
    %14 = vector.shape_cast %13 : vector<1x32x32xf32> to vector<32x32xf32>
    %c3_17 = arith.constant 3 : index
    %c0_18 = arith.constant 0 : index
    %c0_19 = arith.constant 0 : index
    %15 = vector.load %arg4[%c3_17, %c0_18, %c0_19] : memref<4x32x32xf32, #tpu.memory_space<vmem>>, vector<1x32x32xf32>
    %16 = vector.shape_cast %15 : vector<1x32x32xf32> to vector<32x32xf32>
    %c0_20 = arith.constant 0 : index
    %c0_21 = arith.constant 0 : index
    %c0_22 = arith.constant 0 : index
    %17 = vector.load %arg5[%c0_20, %c0_21, %c0_22] : memref<4x1x32xf32, #tpu.memory_space<vmem>>, vector<1x1x32xf32>
    %18 = vector.shape_cast %17 : vector<1x1x32xf32> to vector<1x32xf32>
    %c1_23 = arith.constant 1 : index
    %c0_24 = arith.constant 0 : index
    %c0_25 = arith.constant 0 : index
    %19 = vector.load %arg5[%c1_23, %c0_24, %c0_25] : memref<4x1x32xf32, #tpu.memory_space<vmem>>, vector<1x1x32xf32>
    %20 = vector.shape_cast %19 : vector<1x1x32xf32> to vector<1x32xf32>
    %c2_26 = arith.constant 2 : index
    %c0_27 = arith.constant 0 : index
    %c0_28 = arith.constant 0 : index
    %21 = vector.load %arg5[%c2_26, %c0_27, %c0_28] : memref<4x1x32xf32, #tpu.memory_space<vmem>>, vector<1x1x32xf32>
    %22 = vector.shape_cast %21 : vector<1x1x32xf32> to vector<1x32xf32>
    %c3_29 = arith.constant 3 : index
    %c0_30 = arith.constant 0 : index
    %c0_31 = arith.constant 0 : index
    %23 = vector.load %arg5[%c3_29, %c0_30, %c0_31] : memref<4x1x32xf32, #tpu.memory_space<vmem>>, vector<1x1x32xf32>
    %24 = vector.shape_cast %23 : vector<1x1x32xf32> to vector<1x32xf32>
    %c0_32 = arith.constant 0 : index
    %c0_33 = arith.constant 0 : index
    %25 = vector.load %arg6[%c0_32, %c0_33] : memref<32x32xf32, #tpu.memory_space<vmem>>, vector<32x32xf32>
    %c0_34 = arith.constant 0 : index
    %c0_35 = arith.constant 0 : index
    %26 = vector.load %arg7[%c0_34, %c0_35] : memref<1x32xf32, #tpu.memory_space<vmem>>, vector<1x32xf32>
    %c0_36 = arith.constant 0 : index
    %c0_37 = arith.constant 0 : index
    %27 = vector.load %arg0[%c0_36, %c0_37] : memref<1x40xf32, #tpu.memory_space<vmem>>, vector<1x40xf32>
    %c0_38 = arith.constant 0 : index
    %c0_39 = arith.constant 0 : index
    %28 = vector.load %arg1[%c0_38, %c0_39] : memref<40x32xf32, #tpu.memory_space<vmem>>, vector<40x32xf32>
    %cst = arith.constant dense<0.000000e+00> : vector<1x32xf32>
    %29 = tpu.matmul %27, %28, %cst {dimension_numbers = #tpu.dot_dimension_numbers<[1], [0], [0], [1], [0, 0, 1, 1], [], []>} : vector<1x40xf32>, vector<40x32xf32>, vector<1x32xf32> -> vector<1x32xf32>
    %c0_40 = arith.constant 0 : index
    %c0_41 = arith.constant 0 : index
    %30 = vector.load %arg2[%c0_40, %c0_41] : memref<1x32xf32, #tpu.memory_space<vmem>>, vector<1x32xf32>
    %31 = arith.addf %29, %30 : vector<1x32xf32>
    %cst_42 = arith.constant 0.000000e+00 : f32
    %32 = vector.broadcast %cst_42 : f32 to vector<1x32xf32>
    %c0_i32 = arith.constant 0 : i32
    %33 = vector.broadcast %c0_i32 : i32 to vector<1x32xi32>
    %34 = arith.cmpi eq, %0, %33 : vector<1x32xi32>
    %35 = arith.extui %34 : vector<1x32xi1> to vector<1x32xi32>
    %36 = arith.sitofp %35 : vector<1x32xi32> to vector<1x32xf32>
    %cst_43 = arith.constant dense<0.000000e+00> : vector<1x32xf32>
    %37 = tpu.matmul %36, %2, %cst_43 {dimension_numbers = #tpu.dot_dimension_numbers<[1], [0], [0], [1], [0, 0, 1, 1], [], []>} : vector<1x32xf32>, vector<32x32xf32>, vector<1x32xf32> -> vector<1x32xf32>
    %cst_44 = arith.constant dense<0.000000e+00> : vector<1x32xf32>
    %38 = tpu.matmul %31, %10, %cst_44 {dimension_numbers = #tpu.dot_dimension_numbers<[1], [0], [0], [1], [0, 0, 1, 1], [], []>} : vector<1x32xf32>, vector<32x32xf32>, vector<1x32xf32> -> vector<1x32xf32>
    %39 = arith.addf %37, %38 : vector<1x32xf32>
    %40 = arith.addf %39, %18 : vector<1x32xf32>
    %41 = arith.negf %40 : vector<1x32xf32>
    %42 = math.exp %41 : vector<1x32xf32>
    %cst_45 = arith.constant 1.000000e+00 : f32
    %43 = vector.broadcast %cst_45 : f32 to vector<1x32xf32>
    %44 = arith.addf %43, %42 : vector<1x32xf32>
    %45 = arith.divf %43, %44 : vector<1x32xf32>
    %cst_46 = arith.constant dense<0.000000e+00> : vector<1x32xf32>
    %46 = tpu.matmul %36, %4, %cst_46 {dimension_numbers = #tpu.dot_dimension_numbers<[1], [0], [0], [1], [0, 0, 1, 1], [], []>} : vector<1x32xf32>, vector<32x32xf32>, vector<1x32xf32> -> vector<1x32xf32>
    %cst_47 = arith.constant dense<0.000000e+00> : vector<1x32xf32>
    %47 = tpu.matmul %31, %12, %cst_47 {dimension_numbers = #tpu.dot_dimension_numbers<[1], [0], [0], [1], [0, 0, 1, 1], [], []>} : vector<1x32xf32>, vector<32x32xf32>, vector<1x32xf32> -> vector<1x32xf32>
    %48 = arith.addf %46, %47 : vector<1x32xf32>
    %49 = arith.addf %48, %20 : vector<1x32xf32>
    %50 = arith.negf %49 : vector<1x32xf32>
    %51 = math.exp %50 : vector<1x32xf32>
    %cst_48 = arith.constant 1.000000e+00 : f32
    %52 = vector.broadcast %cst_48 : f32 to vector<1x32xf32>
    %53 = arith.addf %52, %51 : vector<1x32xf32>
    %54 = arith.divf %52, %53 : vector<1x32xf32>
    %cst_49 = arith.constant dense<0.000000e+00> : vector<1x32xf32>
    %55 = tpu.matmul %36, %6, %cst_49 {dimension_numbers = #tpu.dot_dimension_numbers<[1], [0], [0], [1], [0, 0, 1, 1], [], []>} : vector<1x32xf32>, vector<32x32xf32>, vector<1x32xf32> -> vector<1x32xf32>
    %cst_50 = arith.constant dense<0.000000e+00> : vector<1x32xf32>
    %56 = tpu.matmul %31, %14, %cst_50 {dimension_numbers = #tpu.dot_dimension_numbers<[1], [0], [0], [1], [0, 0, 1, 1], [], []>} : vector<1x32xf32>, vector<32x32xf32>, vector<1x32xf32> -> vector<1x32xf32>
    %57 = arith.addf %55, %56 : vector<1x32xf32>
    %58 = arith.addf %57, %22 : vector<1x32xf32>
    %59 = math.tanh %58 : vector<1x32xf32>
    %cst_51 = arith.constant dense<0.000000e+00> : vector<1x32xf32>
    %60 = tpu.matmul %36, %8, %cst_51 {dimension_numbers = #tpu.dot_dimension_numbers<[1], [0], [0], [1], [0, 0, 1, 1], [], []>} : vector<1x32xf32>, vector<32x32xf32>, vector<1x32xf32> -> vector<1x32xf32>
    %cst_52 = arith.constant dense<0.000000e+00> : vector<1x32xf32>
    %61 = tpu.matmul %31, %16, %cst_52 {dimension_numbers = #tpu.dot_dimension_numbers<[1], [0], [0], [1], [0, 0, 1, 1], [], []>} : vector<1x32xf32>, vector<32x32xf32>, vector<1x32xf32> -> vector<1x32xf32>
    %62 = arith.addf %60, %61 : vector<1x32xf32>
    %63 = arith.addf %62, %24 : vector<1x32xf32>
    %64 = arith.negf %63 : vector<1x32xf32>
    %65 = math.exp %64 : vector<1x32xf32>
    %cst_53 = arith.constant 1.000000e+00 : f32
    %66 = vector.broadcast %cst_53 : f32 to vector<1x32xf32>
    %67 = arith.addf %66, %65 : vector<1x32xf32>
    %68 = arith.divf %66, %67 : vector<1x32xf32>
    %69 = arith.mulf %54, %32 : vector<1x32xf32>
    %70 = arith.mulf %45, %59 : vector<1x32xf32>
    %71 = arith.addf %69, %70 : vector<1x32xf32>
    %72 = math.tanh %71 : vector<1x32xf32>
    %73 = arith.mulf %68, %72 : vector<1x32xf32>
    %cst_54 = arith.constant dense<0.000000e+00> : vector<1x32xf32>
    %74 = tpu.matmul %73, %25, %cst_54 {dimension_numbers = #tpu.dot_dimension_numbers<[1], [0], [0], [1], [0, 0, 1, 1], [], []>} : vector<1x32xf32>, vector<32x32xf32>, vector<1x32xf32> -> vector<1x32xf32>
    %75 = arith.addf %74, %26 : vector<1x32xf32>
    %cst_55 = arith.constant dense<0xFF800000> : vector<1xf32>
    %76 = vector.multi_reduction <maximumf>, %75, %cst_55 [1] : vector<1x32xf32> to vector<1xf32>
    %77 = vector.shape_cast %76 : vector<1xf32> to vector<1x1xf32>
    %78 = vector.broadcast %77 : vector<1x1xf32> to vector<1x32xf32>
    %79 = arith.cmpf oeq, %75, %78 : vector<1x32xf32>
    %c32_i32 = arith.constant 32 : i32
    %80 = vector.broadcast %c32_i32 : i32 to vector<1x32xi32>
    %81 = arith.select %79, %0, %80 : vector<1x32xi1>, vector<1x32xi32>
    %cst_56 = arith.constant dense<2147483647> : vector<1xi32>
    %82 = vector.multi_reduction <minsi>, %81, %cst_56 [1] : vector<1x32xi32> to vector<1xi32>
    %83 = vector.shape_cast %82 : vector<1xi32> to vector<1x1xi32>
    %84 = vector.broadcast %83 : vector<1x1xi32> to vector<1x32xi32>
    %85 = arith.cmpi eq, %0, %84 : vector<1x32xi32>
    %86 = arith.extui %85 : vector<1x32xi1> to vector<1x32xi32>
    %87 = arith.sitofp %86 : vector<1x32xi32> to vector<1x32xf32>
    %cst_57 = arith.constant dense<0.000000e+00> : vector<1x32xf32>
    %88 = tpu.matmul %87, %2, %cst_57 {dimension_numbers = #tpu.dot_dimension_numbers<[1], [0], [0], [1], [0, 0, 1, 1], [], []>} : vector<1x32xf32>, vector<32x32xf32>, vector<1x32xf32> -> vector<1x32xf32>
    %cst_58 = arith.constant dense<0.000000e+00> : vector<1x32xf32>
    %89 = tpu.matmul %73, %10, %cst_58 {dimension_numbers = #tpu.dot_dimension_numbers<[1], [0], [0], [1], [0, 0, 1, 1], [], []>} : vector<1x32xf32>, vector<32x32xf32>, vector<1x32xf32> -> vector<1x32xf32>
    %90 = arith.addf %88, %89 : vector<1x32xf32>
    %91 = arith.addf %90, %18 : vector<1x32xf32>
    %92 = arith.negf %91 : vector<1x32xf32>
    %93 = math.exp %92 : vector<1x32xf32>
    %cst_59 = arith.constant 1.000000e+00 : f32
    %94 = vector.broadcast %cst_59 : f32 to vector<1x32xf32>
    %95 = arith.addf %94, %93 : vector<1x32xf32>
    %96 = arith.divf %94, %95 : vector<1x32xf32>
    %cst_60 = arith.constant dense<0.000000e+00> : vector<1x32xf32>
    %97 = tpu.matmul %87, %4, %cst_60 {dimension_numbers = #tpu.dot_dimension_numbers<[1], [0], [0], [1], [0, 0, 1, 1], [], []>} : vector<1x32xf32>, vector<32x32xf32>, vector<1x32xf32> -> vector<1x32xf32>
    %cst_61 = arith.constant dense<0.000000e+00> : vector<1x32xf32>
    %98 = tpu.matmul %73, %12, %cst_61 {dimension_numbers = #tpu.dot_dimension_numbers<[1], [0], [0], [1], [0, 0, 1, 1], [], []>} : vector<1x32xf32>, vector<32x32xf32>, vector<1x32xf32> -> vector<1x32xf32>
    %99 = arith.addf %97, %98 : vector<1x32xf32>
    %100 = arith.addf %99, %20 : vector<1x32xf32>
    %101 = arith.negf %100 : vector<1x32xf32>
    %102 = math.exp %101 : vector<1x32xf32>
    %cst_62 = arith.constant 1.000000e+00 : f32
    %103 = vector.broadcast %cst_62 : f32 to vector<1x32xf32>
    %104 = arith.addf %103, %102 : vector<1x32xf32>
    %105 = arith.divf %103, %104 : vector<1x32xf32>
    %cst_63 = arith.constant dense<0.000000e+00> : vector<1x32xf32>
    %106 = tpu.matmul %87, %6, %cst_63 {dimension_numbers = #tpu.dot_dimension_numbers<[1], [0], [0], [1], [0, 0, 1, 1], [], []>} : vector<1x32xf32>, vector<32x32xf32>, vector<1x32xf32> -> vector<1x32xf32>
    %cst_64 = arith.constant dense<0.000000e+00> : vector<1x32xf32>
    %107 = tpu.matmul %73, %14, %cst_64 {dimension_numbers = #tpu.dot_dimension_numbers<[1], [0], [0], [1], [0, 0, 1, 1], [], []>} : vector<1x32xf32>, vector<32x32xf32>, vector<1x32xf32> -> vector<1x32xf32>
    %108 = arith.addf %106, %107 : vector<1x32xf32>
    %109 = arith.addf %108, %22 : vector<1x32xf32>
    %110 = math.tanh %109 : vector<1x32xf32>
    %cst_65 = arith.constant dense<0.000000e+00> : vector<1x32xf32>
    %111 = tpu.matmul %87, %8, %cst_65 {dimension_numbers = #tpu.dot_dimension_numbers<[1], [0], [0], [1], [0, 0, 1, 1], [], []>} : vector<1x32xf32>, vector<32x32xf32>, vector<1x32xf32> -> vector<1x32xf32>
    %cst_66 = arith.constant dense<0.000000e+00> : vector<1x32xf32>
    %112 = tpu.matmul %73, %16, %cst_66 {dimension_numbers = #tpu.dot_dimension_numbers<[1], [0], [0], [1], [0, 0, 1, 1], [], []>} : vector<1x32xf32>, vector<32x32xf32>, vector<1x32xf32> -> vector<1x32xf32>
    %113 = arith.addf %111, %112 : vector<1x32xf32>
    %114 = arith.addf %113, %24 : vector<1x32xf32>
    %115 = arith.negf %114 : vector<1x32xf32>
    %116 = math.exp %115 : vector<1x32xf32>
    %cst_67 = arith.constant 1.000000e+00 : f32
    %117 = vector.broadcast %cst_67 : f32 to vector<1x32xf32>
    %118 = arith.addf %117, %116 : vector<1x32xf32>
    %119 = arith.divf %117, %118 : vector<1x32xf32>
    %120 = arith.mulf %105, %71 : vector<1x32xf32>
    %121 = arith.mulf %96, %110 : vector<1x32xf32>
    %122 = arith.addf %120, %121 : vector<1x32xf32>
    %123 = math.tanh %122 : vector<1x32xf32>
    %124 = arith.mulf %119, %123 : vector<1x32xf32>
    %cst_68 = arith.constant dense<0.000000e+00> : vector<1x32xf32>
    %125 = tpu.matmul %124, %25, %cst_68 {dimension_numbers = #tpu.dot_dimension_numbers<[1], [0], [0], [1], [0, 0, 1, 1], [], []>} : vector<1x32xf32>, vector<32x32xf32>, vector<1x32xf32> -> vector<1x32xf32>
    %126 = arith.addf %125, %26 : vector<1x32xf32>
    %cst_69 = arith.constant dense<0xFF800000> : vector<1xf32>
    %127 = vector.multi_reduction <maximumf>, %126, %cst_69 [1] : vector<1x32xf32> to vector<1xf32>
    %128 = vector.shape_cast %127 : vector<1xf32> to vector<1x1xf32>
    %129 = vector.broadcast %128 : vector<1x1xf32> to vector<1x32xf32>
    %130 = arith.cmpf oeq, %126, %129 : vector<1x32xf32>
    %c32_i32_70 = arith.constant 32 : i32
    %131 = vector.broadcast %c32_i32_70 : i32 to vector<1x32xi32>
    %132 = arith.select %130, %0, %131 : vector<1x32xi1>, vector<1x32xi32>
    %cst_71 = arith.constant dense<2147483647> : vector<1xi32>
    %133 = vector.multi_reduction <minsi>, %132, %cst_71 [1] : vector<1x32xi32> to vector<1xi32>
    %134 = vector.shape_cast %133 : vector<1xi32> to vector<1x1xi32>
    %135 = vector.broadcast %134 : vector<1x1xi32> to vector<1x32xi32>
    %136 = arith.cmpi eq, %0, %135 : vector<1x32xi32>
    %137 = arith.extui %136 : vector<1x32xi1> to vector<1x32xi32>
    %138 = arith.sitofp %137 : vector<1x32xi32> to vector<1x32xf32>
    %cst_72 = arith.constant dense<0.000000e+00> : vector<1x32xf32>
    %139 = tpu.matmul %138, %2, %cst_72 {dimension_numbers = #tpu.dot_dimension_numbers<[1], [0], [0], [1], [0, 0, 1, 1], [], []>} : vector<1x32xf32>, vector<32x32xf32>, vector<1x32xf32> -> vector<1x32xf32>
    %cst_73 = arith.constant dense<0.000000e+00> : vector<1x32xf32>
    %140 = tpu.matmul %124, %10, %cst_73 {dimension_numbers = #tpu.dot_dimension_numbers<[1], [0], [0], [1], [0, 0, 1, 1], [], []>} : vector<1x32xf32>, vector<32x32xf32>, vector<1x32xf32> -> vector<1x32xf32>
    %141 = arith.addf %139, %140 : vector<1x32xf32>
    %142 = arith.addf %141, %18 : vector<1x32xf32>
    %143 = arith.negf %142 : vector<1x32xf32>
    %144 = math.exp %143 : vector<1x32xf32>
    %cst_74 = arith.constant 1.000000e+00 : f32
    %145 = vector.broadcast %cst_74 : f32 to vector<1x32xf32>
    %146 = arith.addf %145, %144 : vector<1x32xf32>
    %147 = arith.divf %145, %146 : vector<1x32xf32>
    %cst_75 = arith.constant dense<0.000000e+00> : vector<1x32xf32>
    %148 = tpu.matmul %138, %4, %cst_75 {dimension_numbers = #tpu.dot_dimension_numbers<[1], [0], [0], [1], [0, 0, 1, 1], [], []>} : vector<1x32xf32>, vector<32x32xf32>, vector<1x32xf32> -> vector<1x32xf32>
    %cst_76 = arith.constant dense<0.000000e+00> : vector<1x32xf32>
    %149 = tpu.matmul %124, %12, %cst_76 {dimension_numbers = #tpu.dot_dimension_numbers<[1], [0], [0], [1], [0, 0, 1, 1], [], []>} : vector<1x32xf32>, vector<32x32xf32>, vector<1x32xf32> -> vector<1x32xf32>
    %150 = arith.addf %148, %149 : vector<1x32xf32>
    %151 = arith.addf %150, %20 : vector<1x32xf32>
    %152 = arith.negf %151 : vector<1x32xf32>
    %153 = math.exp %152 : vector<1x32xf32>
    %cst_77 = arith.constant 1.000000e+00 : f32
    %154 = vector.broadcast %cst_77 : f32 to vector<1x32xf32>
    %155 = arith.addf %154, %153 : vector<1x32xf32>
    %156 = arith.divf %154, %155 : vector<1x32xf32>
    %cst_78 = arith.constant dense<0.000000e+00> : vector<1x32xf32>
    %157 = tpu.matmul %138, %6, %cst_78 {dimension_numbers = #tpu.dot_dimension_numbers<[1], [0], [0], [1], [0, 0, 1, 1], [], []>} : vector<1x32xf32>, vector<32x32xf32>, vector<1x32xf32> -> vector<1x32xf32>
    %cst_79 = arith.constant dense<0.000000e+00> : vector<1x32xf32>
    %158 = tpu.matmul %124, %14, %cst_79 {dimension_numbers = #tpu.dot_dimension_numbers<[1], [0], [0], [1], [0, 0, 1, 1], [], []>} : vector<1x32xf32>, vector<32x32xf32>, vector<1x32xf32> -> vector<1x32xf32>
    %159 = arith.addf %157, %158 : vector<1x32xf32>
    %160 = arith.addf %159, %22 : vector<1x32xf32>
    %161 = math.tanh %160 : vector<1x32xf32>
    %cst_80 = arith.constant dense<0.000000e+00> : vector<1x32xf32>
    %162 = tpu.matmul %138, %8, %cst_80 {dimension_numbers = #tpu.dot_dimension_numbers<[1], [0], [0], [1], [0, 0, 1, 1], [], []>} : vector<1x32xf32>, vector<32x32xf32>, vector<1x32xf32> -> vector<1x32xf32>
    %cst_81 = arith.constant dense<0.000000e+00> : vector<1x32xf32>
    %163 = tpu.matmul %124, %16, %cst_81 {dimension_numbers = #tpu.dot_dimension_numbers<[1], [0], [0], [1], [0, 0, 1, 1], [], []>} : vector<1x32xf32>, vector<32x32xf32>, vector<1x32xf32> -> vector<1x32xf32>
    %164 = arith.addf %162, %163 : vector<1x32xf32>
    %165 = arith.addf %164, %24 : vector<1x32xf32>
    %166 = arith.negf %165 : vector<1x32xf32>
    %167 = math.exp %166 : vector<1x32xf32>
    %cst_82 = arith.constant 1.000000e+00 : f32
    %168 = vector.broadcast %cst_82 : f32 to vector<1x32xf32>
    %169 = arith.addf %168, %167 : vector<1x32xf32>
    %170 = arith.divf %168, %169 : vector<1x32xf32>
    %171 = arith.mulf %156, %122 : vector<1x32xf32>
    %172 = arith.mulf %147, %161 : vector<1x32xf32>
    %173 = arith.addf %171, %172 : vector<1x32xf32>
    %174 = math.tanh %173 : vector<1x32xf32>
    %175 = arith.mulf %170, %174 : vector<1x32xf32>
    %cst_83 = arith.constant dense<0.000000e+00> : vector<1x32xf32>
    %176 = tpu.matmul %175, %25, %cst_83 {dimension_numbers = #tpu.dot_dimension_numbers<[1], [0], [0], [1], [0, 0, 1, 1], [], []>} : vector<1x32xf32>, vector<32x32xf32>, vector<1x32xf32> -> vector<1x32xf32>
    %177 = arith.addf %176, %26 : vector<1x32xf32>
    %cst_84 = arith.constant dense<0xFF800000> : vector<1xf32>
    %178 = vector.multi_reduction <maximumf>, %177, %cst_84 [1] : vector<1x32xf32> to vector<1xf32>
    %179 = vector.shape_cast %178 : vector<1xf32> to vector<1x1xf32>
    %180 = vector.broadcast %179 : vector<1x1xf32> to vector<1x32xf32>
    %181 = arith.cmpf oeq, %177, %180 : vector<1x32xf32>
    %c32_i32_85 = arith.constant 32 : i32
    %182 = vector.broadcast %c32_i32_85 : i32 to vector<1x32xi32>
    %183 = arith.select %181, %0, %182 : vector<1x32xi1>, vector<1x32xi32>
    %cst_86 = arith.constant dense<2147483647> : vector<1xi32>
    %184 = vector.multi_reduction <minsi>, %183, %cst_86 [1] : vector<1x32xi32> to vector<1xi32>
    %185 = vector.shape_cast %184 : vector<1xi32> to vector<1x1xi32>
    %186 = vector.broadcast %185 : vector<1x1xi32> to vector<1x32xi32>
    %187 = arith.cmpi eq, %0, %186 : vector<1x32xi32>
    %188 = arith.extui %187 : vector<1x32xi1> to vector<1x32xi32>
    %189 = arith.sitofp %188 : vector<1x32xi32> to vector<1x32xf32>
    %cst_87 = arith.constant dense<0.000000e+00> : vector<1x32xf32>
    %190 = tpu.matmul %189, %2, %cst_87 {dimension_numbers = #tpu.dot_dimension_numbers<[1], [0], [0], [1], [0, 0, 1, 1], [], []>} : vector<1x32xf32>, vector<32x32xf32>, vector<1x32xf32> -> vector<1x32xf32>
    %cst_88 = arith.constant dense<0.000000e+00> : vector<1x32xf32>
    %191 = tpu.matmul %175, %10, %cst_88 {dimension_numbers = #tpu.dot_dimension_numbers<[1], [0], [0], [1], [0, 0, 1, 1], [], []>} : vector<1x32xf32>, vector<32x32xf32>, vector<1x32xf32> -> vector<1x32xf32>
    %192 = arith.addf %190, %191 : vector<1x32xf32>
    %193 = arith.addf %192, %18 : vector<1x32xf32>
    %194 = arith.negf %193 : vector<1x32xf32>
    %195 = math.exp %194 : vector<1x32xf32>
    %cst_89 = arith.constant 1.000000e+00 : f32
    %196 = vector.broadcast %cst_89 : f32 to vector<1x32xf32>
    %197 = arith.addf %196, %195 : vector<1x32xf32>
    %198 = arith.divf %196, %197 : vector<1x32xf32>
    %cst_90 = arith.constant dense<0.000000e+00> : vector<1x32xf32>
    %199 = tpu.matmul %189, %4, %cst_90 {dimension_numbers = #tpu.dot_dimension_numbers<[1], [0], [0], [1], [0, 0, 1, 1], [], []>} : vector<1x32xf32>, vector<32x32xf32>, vector<1x32xf32> -> vector<1x32xf32>
    %cst_91 = arith.constant dense<0.000000e+00> : vector<1x32xf32>
    %200 = tpu.matmul %175, %12, %cst_91 {dimension_numbers = #tpu.dot_dimension_numbers<[1], [0], [0], [1], [0, 0, 1, 1], [], []>} : vector<1x32xf32>, vector<32x32xf32>, vector<1x32xf32> -> vector<1x32xf32>
    %201 = arith.addf %199, %200 : vector<1x32xf32>
    %202 = arith.addf %201, %20 : vector<1x32xf32>
    %203 = arith.negf %202 : vector<1x32xf32>
    %204 = math.exp %203 : vector<1x32xf32>
    %cst_92 = arith.constant 1.000000e+00 : f32
    %205 = vector.broadcast %cst_92 : f32 to vector<1x32xf32>
    %206 = arith.addf %205, %204 : vector<1x32xf32>
    %207 = arith.divf %205, %206 : vector<1x32xf32>
    %cst_93 = arith.constant dense<0.000000e+00> : vector<1x32xf32>
    %208 = tpu.matmul %189, %6, %cst_93 {dimension_numbers = #tpu.dot_dimension_numbers<[1], [0], [0], [1], [0, 0, 1, 1], [], []>} : vector<1x32xf32>, vector<32x32xf32>, vector<1x32xf32> -> vector<1x32xf32>
    %cst_94 = arith.constant dense<0.000000e+00> : vector<1x32xf32>
    %209 = tpu.matmul %175, %14, %cst_94 {dimension_numbers = #tpu.dot_dimension_numbers<[1], [0], [0], [1], [0, 0, 1, 1], [], []>} : vector<1x32xf32>, vector<32x32xf32>, vector<1x32xf32> -> vector<1x32xf32>
    %210 = arith.addf %208, %209 : vector<1x32xf32>
    %211 = arith.addf %210, %22 : vector<1x32xf32>
    %212 = math.tanh %211 : vector<1x32xf32>
    %cst_95 = arith.constant dense<0.000000e+00> : vector<1x32xf32>
    %213 = tpu.matmul %189, %8, %cst_95 {dimension_numbers = #tpu.dot_dimension_numbers<[1], [0], [0], [1], [0, 0, 1, 1], [], []>} : vector<1x32xf32>, vector<32x32xf32>, vector<1x32xf32> -> vector<1x32xf32>
    %cst_96 = arith.constant dense<0.000000e+00> : vector<1x32xf32>
    %214 = tpu.matmul %175, %16, %cst_96 {dimension_numbers = #tpu.dot_dimension_numbers<[1], [0], [0], [1], [0, 0, 1, 1], [], []>} : vector<1x32xf32>, vector<32x32xf32>, vector<1x32xf32> -> vector<1x32xf32>
    %215 = arith.addf %213, %214 : vector<1x32xf32>
    %216 = arith.addf %215, %24 : vector<1x32xf32>
    %217 = arith.negf %216 : vector<1x32xf32>
    %218 = math.exp %217 : vector<1x32xf32>
    %cst_97 = arith.constant 1.000000e+00 : f32
    %219 = vector.broadcast %cst_97 : f32 to vector<1x32xf32>
    %220 = arith.addf %219, %218 : vector<1x32xf32>
    %221 = arith.divf %219, %220 : vector<1x32xf32>
    %222 = arith.mulf %207, %173 : vector<1x32xf32>
    %223 = arith.mulf %198, %212 : vector<1x32xf32>
    %224 = arith.addf %222, %223 : vector<1x32xf32>
    %225 = math.tanh %224 : vector<1x32xf32>
    %226 = arith.mulf %221, %225 : vector<1x32xf32>
    %cst_98 = arith.constant dense<0.000000e+00> : vector<1x32xf32>
    %227 = tpu.matmul %226, %25, %cst_98 {dimension_numbers = #tpu.dot_dimension_numbers<[1], [0], [0], [1], [0, 0, 1, 1], [], []>} : vector<1x32xf32>, vector<32x32xf32>, vector<1x32xf32> -> vector<1x32xf32>
    %228 = arith.addf %227, %26 : vector<1x32xf32>
    %cst_99 = arith.constant dense<0xFF800000> : vector<1xf32>
    %229 = vector.multi_reduction <maximumf>, %228, %cst_99 [1] : vector<1x32xf32> to vector<1xf32>
    %230 = vector.shape_cast %229 : vector<1xf32> to vector<1x1xf32>
    %231 = vector.broadcast %230 : vector<1x1xf32> to vector<1x32xf32>
    %232 = arith.cmpf oeq, %228, %231 : vector<1x32xf32>
    %c32_i32_100 = arith.constant 32 : i32
    %233 = vector.broadcast %c32_i32_100 : i32 to vector<1x32xi32>
    %234 = arith.select %232, %0, %233 : vector<1x32xi1>, vector<1x32xi32>
    %cst_101 = arith.constant dense<2147483647> : vector<1xi32>
    %235 = vector.multi_reduction <minsi>, %234, %cst_101 [1] : vector<1x32xi32> to vector<1xi32>
    %236 = vector.shape_cast %235 : vector<1xi32> to vector<1x1xi32>
    %237 = vector.broadcast %236 : vector<1x1xi32> to vector<1x32xi32>
    %238 = arith.cmpi eq, %0, %237 : vector<1x32xi32>
    %239 = arith.extui %238 : vector<1x32xi1> to vector<1x32xi32>
    %240 = arith.sitofp %239 : vector<1x32xi32> to vector<1x32xf32>
    %cst_102 = arith.constant dense<0.000000e+00> : vector<1x32xf32>
    %241 = tpu.matmul %240, %2, %cst_102 {dimension_numbers = #tpu.dot_dimension_numbers<[1], [0], [0], [1], [0, 0, 1, 1], [], []>} : vector<1x32xf32>, vector<32x32xf32>, vector<1x32xf32> -> vector<1x32xf32>
    %cst_103 = arith.constant dense<0.000000e+00> : vector<1x32xf32>
    %242 = tpu.matmul %226, %10, %cst_103 {dimension_numbers = #tpu.dot_dimension_numbers<[1], [0], [0], [1], [0, 0, 1, 1], [], []>} : vector<1x32xf32>, vector<32x32xf32>, vector<1x32xf32> -> vector<1x32xf32>
    %243 = arith.addf %241, %242 : vector<1x32xf32>
    %244 = arith.addf %243, %18 : vector<1x32xf32>
    %245 = arith.negf %244 : vector<1x32xf32>
    %246 = math.exp %245 : vector<1x32xf32>
    %cst_104 = arith.constant 1.000000e+00 : f32
    %247 = vector.broadcast %cst_104 : f32 to vector<1x32xf32>
    %248 = arith.addf %247, %246 : vector<1x32xf32>
    %249 = arith.divf %247, %248 : vector<1x32xf32>
    %cst_105 = arith.constant dense<0.000000e+00> : vector<1x32xf32>
    %250 = tpu.matmul %240, %4, %cst_105 {dimension_numbers = #tpu.dot_dimension_numbers<[1], [0], [0], [1], [0, 0, 1, 1], [], []>} : vector<1x32xf32>, vector<32x32xf32>, vector<1x32xf32> -> vector<1x32xf32>
    %cst_106 = arith.constant dense<0.000000e+00> : vector<1x32xf32>
    %251 = tpu.matmul %226, %12, %cst_106 {dimension_numbers = #tpu.dot_dimension_numbers<[1], [0], [0], [1], [0, 0, 1, 1], [], []>} : vector<1x32xf32>, vector<32x32xf32>, vector<1x32xf32> -> vector<1x32xf32>
    %252 = arith.addf %250, %251 : vector<1x32xf32>
    %253 = arith.addf %252, %20 : vector<1x32xf32>
    %254 = arith.negf %253 : vector<1x32xf32>
    %255 = math.exp %254 : vector<1x32xf32>
    %cst_107 = arith.constant 1.000000e+00 : f32
    %256 = vector.broadcast %cst_107 : f32 to vector<1x32xf32>
    %257 = arith.addf %256, %255 : vector<1x32xf32>
    %258 = arith.divf %256, %257 : vector<1x32xf32>
    %cst_108 = arith.constant dense<0.000000e+00> : vector<1x32xf32>
    %259 = tpu.matmul %240, %6, %cst_108 {dimension_numbers = #tpu.dot_dimension_numbers<[1], [0], [0], [1], [0, 0, 1, 1], [], []>} : vector<1x32xf32>, vector<32x32xf32>, vector<1x32xf32> -> vector<1x32xf32>
    %cst_109 = arith.constant dense<0.000000e+00> : vector<1x32xf32>
    %260 = tpu.matmul %226, %14, %cst_109 {dimension_numbers = #tpu.dot_dimension_numbers<[1], [0], [0], [1], [0, 0, 1, 1], [], []>} : vector<1x32xf32>, vector<32x32xf32>, vector<1x32xf32> -> vector<1x32xf32>
    %261 = arith.addf %259, %260 : vector<1x32xf32>
    %262 = arith.addf %261, %22 : vector<1x32xf32>
    %263 = math.tanh %262 : vector<1x32xf32>
    %cst_110 = arith.constant dense<0.000000e+00> : vector<1x32xf32>
    %264 = tpu.matmul %240, %8, %cst_110 {dimension_numbers = #tpu.dot_dimension_numbers<[1], [0], [0], [1], [0, 0, 1, 1], [], []>} : vector<1x32xf32>, vector<32x32xf32>, vector<1x32xf32> -> vector<1x32xf32>
    %cst_111 = arith.constant dense<0.000000e+00> : vector<1x32xf32>
    %265 = tpu.matmul %226, %16, %cst_111 {dimension_numbers = #tpu.dot_dimension_numbers<[1], [0], [0], [1], [0, 0, 1, 1], [], []>} : vector<1x32xf32>, vector<32x32xf32>, vector<1x32xf32> -> vector<1x32xf32>
    %266 = arith.addf %264, %265 : vector<1x32xf32>
    %267 = arith.addf %266, %24 : vector<1x32xf32>
    %268 = arith.negf %267 : vector<1x32xf32>
    %269 = math.exp %268 : vector<1x32xf32>
    %cst_112 = arith.constant 1.000000e+00 : f32
    %270 = vector.broadcast %cst_112 : f32 to vector<1x32xf32>
    %271 = arith.addf %270, %269 : vector<1x32xf32>
    %272 = arith.divf %270, %271 : vector<1x32xf32>
    %273 = arith.mulf %258, %224 : vector<1x32xf32>
    %274 = arith.mulf %249, %263 : vector<1x32xf32>
    %275 = arith.addf %273, %274 : vector<1x32xf32>
    %276 = math.tanh %275 : vector<1x32xf32>
    %277 = arith.mulf %272, %276 : vector<1x32xf32>
    %cst_113 = arith.constant dense<0.000000e+00> : vector<1x32xf32>
    %278 = tpu.matmul %277, %25, %cst_113 {dimension_numbers = #tpu.dot_dimension_numbers<[1], [0], [0], [1], [0, 0, 1, 1], [], []>} : vector<1x32xf32>, vector<32x32xf32>, vector<1x32xf32> -> vector<1x32xf32>
    %279 = arith.addf %278, %26 : vector<1x32xf32>
    %cst_114 = arith.constant dense<0xFF800000> : vector<1xf32>
    %280 = vector.multi_reduction <maximumf>, %279, %cst_114 [1] : vector<1x32xf32> to vector<1xf32>
    %281 = vector.shape_cast %280 : vector<1xf32> to vector<1x1xf32>
    %282 = vector.broadcast %281 : vector<1x1xf32> to vector<1x32xf32>
    %283 = arith.cmpf oeq, %279, %282 : vector<1x32xf32>
    %c32_i32_115 = arith.constant 32 : i32
    %284 = vector.broadcast %c32_i32_115 : i32 to vector<1x32xi32>
    %285 = arith.select %283, %0, %284 : vector<1x32xi1>, vector<1x32xi32>
    %cst_116 = arith.constant dense<2147483647> : vector<1xi32>
    %286 = vector.multi_reduction <minsi>, %285, %cst_116 [1] : vector<1x32xi32> to vector<1xi32>
    %287 = vector.shape_cast %286 : vector<1xi32> to vector<1x1xi32>
    %288 = vector.broadcast %287 : vector<1x1xi32> to vector<1x32xi32>
    %289 = arith.cmpi eq, %0, %288 : vector<1x32xi32>
    %290 = arith.extui %289 : vector<1x32xi1> to vector<1x32xi32>
    %291 = arith.sitofp %290 : vector<1x32xi32> to vector<1x32xf32>
    %cst_117 = arith.constant dense<0.000000e+00> : vector<1x32xf32>
    %292 = tpu.matmul %291, %2, %cst_117 {dimension_numbers = #tpu.dot_dimension_numbers<[1], [0], [0], [1], [0, 0, 1, 1], [], []>} : vector<1x32xf32>, vector<32x32xf32>, vector<1x32xf32> -> vector<1x32xf32>
    %cst_118 = arith.constant dense<0.000000e+00> : vector<1x32xf32>
    %293 = tpu.matmul %277, %10, %cst_118 {dimension_numbers = #tpu.dot_dimension_numbers<[1], [0], [0], [1], [0, 0, 1, 1], [], []>} : vector<1x32xf32>, vector<32x32xf32>, vector<1x32xf32> -> vector<1x32xf32>
    %294 = arith.addf %292, %293 : vector<1x32xf32>
    %295 = arith.addf %294, %18 : vector<1x32xf32>
    %296 = arith.negf %295 : vector<1x32xf32>
    %297 = math.exp %296 : vector<1x32xf32>
    %cst_119 = arith.constant 1.000000e+00 : f32
    %298 = vector.broadcast %cst_119 : f32 to vector<1x32xf32>
    %299 = arith.addf %298, %297 : vector<1x32xf32>
    %300 = arith.divf %298, %299 : vector<1x32xf32>
    %cst_120 = arith.constant dense<0.000000e+00> : vector<1x32xf32>
    %301 = tpu.matmul %291, %4, %cst_120 {dimension_numbers = #tpu.dot_dimension_numbers<[1], [0], [0], [1], [0, 0, 1, 1], [], []>} : vector<1x32xf32>, vector<32x32xf32>, vector<1x32xf32> -> vector<1x32xf32>
    %cst_121 = arith.constant dense<0.000000e+00> : vector<1x32xf32>
    %302 = tpu.matmul %277, %12, %cst_121 {dimension_numbers = #tpu.dot_dimension_numbers<[1], [0], [0], [1], [0, 0, 1, 1], [], []>} : vector<1x32xf32>, vector<32x32xf32>, vector<1x32xf32> -> vector<1x32xf32>
    %303 = arith.addf %301, %302 : vector<1x32xf32>
    %304 = arith.addf %303, %20 : vector<1x32xf32>
    %305 = arith.negf %304 : vector<1x32xf32>
    %306 = math.exp %305 : vector<1x32xf32>
    %cst_122 = arith.constant 1.000000e+00 : f32
    %307 = vector.broadcast %cst_122 : f32 to vector<1x32xf32>
    %308 = arith.addf %307, %306 : vector<1x32xf32>
    %309 = arith.divf %307, %308 : vector<1x32xf32>
    %cst_123 = arith.constant dense<0.000000e+00> : vector<1x32xf32>
    %310 = tpu.matmul %291, %6, %cst_123 {dimension_numbers = #tpu.dot_dimension_numbers<[1], [0], [0], [1], [0, 0, 1, 1], [], []>} : vector<1x32xf32>, vector<32x32xf32>, vector<1x32xf32> -> vector<1x32xf32>
    %cst_124 = arith.constant dense<0.000000e+00> : vector<1x32xf32>
    %311 = tpu.matmul %277, %14, %cst_124 {dimension_numbers = #tpu.dot_dimension_numbers<[1], [0], [0], [1], [0, 0, 1, 1], [], []>} : vector<1x32xf32>, vector<32x32xf32>, vector<1x32xf32> -> vector<1x32xf32>
    %312 = arith.addf %310, %311 : vector<1x32xf32>
    %313 = arith.addf %312, %22 : vector<1x32xf32>
    %314 = math.tanh %313 : vector<1x32xf32>
    %cst_125 = arith.constant dense<0.000000e+00> : vector<1x32xf32>
    %315 = tpu.matmul %291, %8, %cst_125 {dimension_numbers = #tpu.dot_dimension_numbers<[1], [0], [0], [1], [0, 0, 1, 1], [], []>} : vector<1x32xf32>, vector<32x32xf32>, vector<1x32xf32> -> vector<1x32xf32>
    %cst_126 = arith.constant dense<0.000000e+00> : vector<1x32xf32>
    %316 = tpu.matmul %277, %16, %cst_126 {dimension_numbers = #tpu.dot_dimension_numbers<[1], [0], [0], [1], [0, 0, 1, 1], [], []>} : vector<1x32xf32>, vector<32x32xf32>, vector<1x32xf32> -> vector<1x32xf32>
    %317 = arith.addf %315, %316 : vector<1x32xf32>
    %318 = arith.addf %317, %24 : vector<1x32xf32>
    %319 = arith.negf %318 : vector<1x32xf32>
    %320 = math.exp %319 : vector<1x32xf32>
    %cst_127 = arith.constant 1.000000e+00 : f32
    %321 = vector.broadcast %cst_127 : f32 to vector<1x32xf32>
    %322 = arith.addf %321, %320 : vector<1x32xf32>
    %323 = arith.divf %321, %322 : vector<1x32xf32>
    %324 = arith.mulf %309, %275 : vector<1x32xf32>
    %325 = arith.mulf %300, %314 : vector<1x32xf32>
    %326 = arith.addf %324, %325 : vector<1x32xf32>
    %327 = math.tanh %326 : vector<1x32xf32>
    %328 = arith.mulf %323, %327 : vector<1x32xf32>
    %cst_128 = arith.constant dense<0.000000e+00> : vector<1x32xf32>
    %329 = tpu.matmul %328, %25, %cst_128 {dimension_numbers = #tpu.dot_dimension_numbers<[1], [0], [0], [1], [0, 0, 1, 1], [], []>} : vector<1x32xf32>, vector<32x32xf32>, vector<1x32xf32> -> vector<1x32xf32>
    %330 = arith.addf %329, %26 : vector<1x32xf32>
    %cst_129 = arith.constant dense<0xFF800000> : vector<1xf32>
    %331 = vector.multi_reduction <maximumf>, %330, %cst_129 [1] : vector<1x32xf32> to vector<1xf32>
    %332 = vector.shape_cast %331 : vector<1xf32> to vector<1x1xf32>
    %333 = vector.broadcast %332 : vector<1x1xf32> to vector<1x32xf32>
    %334 = arith.cmpf oeq, %330, %333 : vector<1x32xf32>
    %c32_i32_130 = arith.constant 32 : i32
    %335 = vector.broadcast %c32_i32_130 : i32 to vector<1x32xi32>
    %336 = arith.select %334, %0, %335 : vector<1x32xi1>, vector<1x32xi32>
    %cst_131 = arith.constant dense<2147483647> : vector<1xi32>
    %337 = vector.multi_reduction <minsi>, %336, %cst_131 [1] : vector<1x32xi32> to vector<1xi32>
    %338 = vector.shape_cast %337 : vector<1xi32> to vector<1x1xi32>
    %339 = vector.broadcast %338 : vector<1x1xi32> to vector<1x32xi32>
    %340 = arith.cmpi eq, %0, %339 : vector<1x32xi32>
    %341 = arith.extui %340 : vector<1x32xi1> to vector<1x32xi32>
    %342 = arith.sitofp %341 : vector<1x32xi32> to vector<1x32xf32>
    %cst_132 = arith.constant dense<0.000000e+00> : vector<1x32xf32>
    %343 = tpu.matmul %342, %2, %cst_132 {dimension_numbers = #tpu.dot_dimension_numbers<[1], [0], [0], [1], [0, 0, 1, 1], [], []>} : vector<1x32xf32>, vector<32x32xf32>, vector<1x32xf32> -> vector<1x32xf32>
    %cst_133 = arith.constant dense<0.000000e+00> : vector<1x32xf32>
    %344 = tpu.matmul %328, %10, %cst_133 {dimension_numbers = #tpu.dot_dimension_numbers<[1], [0], [0], [1], [0, 0, 1, 1], [], []>} : vector<1x32xf32>, vector<32x32xf32>, vector<1x32xf32> -> vector<1x32xf32>
    %345 = arith.addf %343, %344 : vector<1x32xf32>
    %346 = arith.addf %345, %18 : vector<1x32xf32>
    %347 = arith.negf %346 : vector<1x32xf32>
    %348 = math.exp %347 : vector<1x32xf32>
    %cst_134 = arith.constant 1.000000e+00 : f32
    %349 = vector.broadcast %cst_134 : f32 to vector<1x32xf32>
    %350 = arith.addf %349, %348 : vector<1x32xf32>
    %351 = arith.divf %349, %350 : vector<1x32xf32>
    %cst_135 = arith.constant dense<0.000000e+00> : vector<1x32xf32>
    %352 = tpu.matmul %342, %4, %cst_135 {dimension_numbers = #tpu.dot_dimension_numbers<[1], [0], [0], [1], [0, 0, 1, 1], [], []>} : vector<1x32xf32>, vector<32x32xf32>, vector<1x32xf32> -> vector<1x32xf32>
    %cst_136 = arith.constant dense<0.000000e+00> : vector<1x32xf32>
    %353 = tpu.matmul %328, %12, %cst_136 {dimension_numbers = #tpu.dot_dimension_numbers<[1], [0], [0], [1], [0, 0, 1, 1], [], []>} : vector<1x32xf32>, vector<32x32xf32>, vector<1x32xf32> -> vector<1x32xf32>
    %354 = arith.addf %352, %353 : vector<1x32xf32>
    %355 = arith.addf %354, %20 : vector<1x32xf32>
    %356 = arith.negf %355 : vector<1x32xf32>
    %357 = math.exp %356 : vector<1x32xf32>
    %cst_137 = arith.constant 1.000000e+00 : f32
    %358 = vector.broadcast %cst_137 : f32 to vector<1x32xf32>
    %359 = arith.addf %358, %357 : vector<1x32xf32>
    %360 = arith.divf %358, %359 : vector<1x32xf32>
    %cst_138 = arith.constant dense<0.000000e+00> : vector<1x32xf32>
    %361 = tpu.matmul %342, %6, %cst_138 {dimension_numbers = #tpu.dot_dimension_numbers<[1], [0], [0], [1], [0, 0, 1, 1], [], []>} : vector<1x32xf32>, vector<32x32xf32>, vector<1x32xf32> -> vector<1x32xf32>
    %cst_139 = arith.constant dense<0.000000e+00> : vector<1x32xf32>
    %362 = tpu.matmul %328, %14, %cst_139 {dimension_numbers = #tpu.dot_dimension_numbers<[1], [0], [0], [1], [0, 0, 1, 1], [], []>} : vector<1x32xf32>, vector<32x32xf32>, vector<1x32xf32> -> vector<1x32xf32>
    %363 = arith.addf %361, %362 : vector<1x32xf32>
    %364 = arith.addf %363, %22 : vector<1x32xf32>
    %365 = math.tanh %364 : vector<1x32xf32>
    %cst_140 = arith.constant dense<0.000000e+00> : vector<1x32xf32>
    %366 = tpu.matmul %342, %8, %cst_140 {dimension_numbers = #tpu.dot_dimension_numbers<[1], [0], [0], [1], [0, 0, 1, 1], [], []>} : vector<1x32xf32>, vector<32x32xf32>, vector<1x32xf32> -> vector<1x32xf32>
    %cst_141 = arith.constant dense<0.000000e+00> : vector<1x32xf32>
    %367 = tpu.matmul %328, %16, %cst_141 {dimension_numbers = #tpu.dot_dimension_numbers<[1], [0], [0], [1], [0, 0, 1, 1], [], []>} : vector<1x32xf32>, vector<32x32xf32>, vector<1x32xf32> -> vector<1x32xf32>
    %368 = arith.addf %366, %367 : vector<1x32xf32>
    %369 = arith.addf %368, %24 : vector<1x32xf32>
    %370 = arith.negf %369 : vector<1x32xf32>
    %371 = math.exp %370 : vector<1x32xf32>
    %cst_142 = arith.constant 1.000000e+00 : f32
    %372 = vector.broadcast %cst_142 : f32 to vector<1x32xf32>
    %373 = arith.addf %372, %371 : vector<1x32xf32>
    %374 = arith.divf %372, %373 : vector<1x32xf32>
    %375 = arith.mulf %360, %326 : vector<1x32xf32>
    %376 = arith.mulf %351, %365 : vector<1x32xf32>
    %377 = arith.addf %375, %376 : vector<1x32xf32>
    %378 = math.tanh %377 : vector<1x32xf32>
    %379 = arith.mulf %374, %378 : vector<1x32xf32>
    %cst_143 = arith.constant dense<0.000000e+00> : vector<1x32xf32>
    %380 = tpu.matmul %379, %25, %cst_143 {dimension_numbers = #tpu.dot_dimension_numbers<[1], [0], [0], [1], [0, 0, 1, 1], [], []>} : vector<1x32xf32>, vector<32x32xf32>, vector<1x32xf32> -> vector<1x32xf32>
    %381 = arith.addf %380, %26 : vector<1x32xf32>
    %cst_144 = arith.constant dense<0xFF800000> : vector<1xf32>
    %382 = vector.multi_reduction <maximumf>, %381, %cst_144 [1] : vector<1x32xf32> to vector<1xf32>
    %383 = vector.shape_cast %382 : vector<1xf32> to vector<1x1xf32>
    %384 = vector.broadcast %383 : vector<1x1xf32> to vector<1x32xf32>
    %385 = arith.cmpf oeq, %381, %384 : vector<1x32xf32>
    %c32_i32_145 = arith.constant 32 : i32
    %386 = vector.broadcast %c32_i32_145 : i32 to vector<1x32xi32>
    %387 = arith.select %385, %0, %386 : vector<1x32xi1>, vector<1x32xi32>
    %cst_146 = arith.constant dense<2147483647> : vector<1xi32>
    %388 = vector.multi_reduction <minsi>, %387, %cst_146 [1] : vector<1x32xi32> to vector<1xi32>
    %389 = vector.shape_cast %388 : vector<1xi32> to vector<1x1xi32>
    %390 = vector.broadcast %389 : vector<1x1xi32> to vector<1x32xi32>
    %391 = arith.cmpi eq, %0, %390 : vector<1x32xi32>
    %392 = arith.extui %391 : vector<1x32xi1> to vector<1x32xi32>
    %393 = arith.sitofp %392 : vector<1x32xi32> to vector<1x32xf32>
    %cst_147 = arith.constant dense<0.000000e+00> : vector<1x32xf32>
    %394 = tpu.matmul %393, %2, %cst_147 {dimension_numbers = #tpu.dot_dimension_numbers<[1], [0], [0], [1], [0, 0, 1, 1], [], []>} : vector<1x32xf32>, vector<32x32xf32>, vector<1x32xf32> -> vector<1x32xf32>
    %cst_148 = arith.constant dense<0.000000e+00> : vector<1x32xf32>
    %395 = tpu.matmul %379, %10, %cst_148 {dimension_numbers = #tpu.dot_dimension_numbers<[1], [0], [0], [1], [0, 0, 1, 1], [], []>} : vector<1x32xf32>, vector<32x32xf32>, vector<1x32xf32> -> vector<1x32xf32>
    %396 = arith.addf %394, %395 : vector<1x32xf32>
    %397 = arith.addf %396, %18 : vector<1x32xf32>
    %398 = arith.negf %397 : vector<1x32xf32>
    %399 = math.exp %398 : vector<1x32xf32>
    %cst_149 = arith.constant 1.000000e+00 : f32
    %400 = vector.broadcast %cst_149 : f32 to vector<1x32xf32>
    %401 = arith.addf %400, %399 : vector<1x32xf32>
    %402 = arith.divf %400, %401 : vector<1x32xf32>
    %cst_150 = arith.constant dense<0.000000e+00> : vector<1x32xf32>
    %403 = tpu.matmul %393, %4, %cst_150 {dimension_numbers = #tpu.dot_dimension_numbers<[1], [0], [0], [1], [0, 0, 1, 1], [], []>} : vector<1x32xf32>, vector<32x32xf32>, vector<1x32xf32> -> vector<1x32xf32>
    %cst_151 = arith.constant dense<0.000000e+00> : vector<1x32xf32>
    %404 = tpu.matmul %379, %12, %cst_151 {dimension_numbers = #tpu.dot_dimension_numbers<[1], [0], [0], [1], [0, 0, 1, 1], [], []>} : vector<1x32xf32>, vector<32x32xf32>, vector<1x32xf32> -> vector<1x32xf32>
    %405 = arith.addf %403, %404 : vector<1x32xf32>
    %406 = arith.addf %405, %20 : vector<1x32xf32>
    %407 = arith.negf %406 : vector<1x32xf32>
    %408 = math.exp %407 : vector<1x32xf32>
    %cst_152 = arith.constant 1.000000e+00 : f32
    %409 = vector.broadcast %cst_152 : f32 to vector<1x32xf32>
    %410 = arith.addf %409, %408 : vector<1x32xf32>
    %411 = arith.divf %409, %410 : vector<1x32xf32>
    %cst_153 = arith.constant dense<0.000000e+00> : vector<1x32xf32>
    %412 = tpu.matmul %393, %6, %cst_153 {dimension_numbers = #tpu.dot_dimension_numbers<[1], [0], [0], [1], [0, 0, 1, 1], [], []>} : vector<1x32xf32>, vector<32x32xf32>, vector<1x32xf32> -> vector<1x32xf32>
    %cst_154 = arith.constant dense<0.000000e+00> : vector<1x32xf32>
    %413 = tpu.matmul %379, %14, %cst_154 {dimension_numbers = #tpu.dot_dimension_numbers<[1], [0], [0], [1], [0, 0, 1, 1], [], []>} : vector<1x32xf32>, vector<32x32xf32>, vector<1x32xf32> -> vector<1x32xf32>
    %414 = arith.addf %412, %413 : vector<1x32xf32>
    %415 = arith.addf %414, %22 : vector<1x32xf32>
    %416 = math.tanh %415 : vector<1x32xf32>
    %cst_155 = arith.constant dense<0.000000e+00> : vector<1x32xf32>
    %417 = tpu.matmul %393, %8, %cst_155 {dimension_numbers = #tpu.dot_dimension_numbers<[1], [0], [0], [1], [0, 0, 1, 1], [], []>} : vector<1x32xf32>, vector<32x32xf32>, vector<1x32xf32> -> vector<1x32xf32>
    %cst_156 = arith.constant dense<0.000000e+00> : vector<1x32xf32>
    %418 = tpu.matmul %379, %16, %cst_156 {dimension_numbers = #tpu.dot_dimension_numbers<[1], [0], [0], [1], [0, 0, 1, 1], [], []>} : vector<1x32xf32>, vector<32x32xf32>, vector<1x32xf32> -> vector<1x32xf32>
    %419 = arith.addf %417, %418 : vector<1x32xf32>
    %420 = arith.addf %419, %24 : vector<1x32xf32>
    %421 = arith.negf %420 : vector<1x32xf32>
    %422 = math.exp %421 : vector<1x32xf32>
    %cst_157 = arith.constant 1.000000e+00 : f32
    %423 = vector.broadcast %cst_157 : f32 to vector<1x32xf32>
    %424 = arith.addf %423, %422 : vector<1x32xf32>
    %425 = arith.divf %423, %424 : vector<1x32xf32>
    %426 = arith.mulf %411, %377 : vector<1x32xf32>
    %427 = arith.mulf %402, %416 : vector<1x32xf32>
    %428 = arith.addf %426, %427 : vector<1x32xf32>
    %429 = math.tanh %428 : vector<1x32xf32>
    %430 = arith.mulf %425, %429 : vector<1x32xf32>
    %cst_158 = arith.constant dense<0.000000e+00> : vector<1x32xf32>
    %431 = tpu.matmul %430, %25, %cst_158 {dimension_numbers = #tpu.dot_dimension_numbers<[1], [0], [0], [1], [0, 0, 1, 1], [], []>} : vector<1x32xf32>, vector<32x32xf32>, vector<1x32xf32> -> vector<1x32xf32>
    %432 = arith.addf %431, %26 : vector<1x32xf32>
    %433 = tpu.concatenate %75, %126, %177, %228, %279, %330, %381, %432 in 0 : vector<1x32xf32>, vector<1x32xf32>, vector<1x32xf32>, vector<1x32xf32>, vector<1x32xf32>, vector<1x32xf32>, vector<1x32xf32>, vector<1x32xf32> -> vector<8x32xf32>
    %c0_159 = arith.constant 0 : index
    %c0_160 = arith.constant 0 : index
    %434 = vector.load %arg8[%c0_159, %c0_160] : memref<8x32xf32, #tpu.memory_space<vmem>>, vector<8x32xf32>
    tpu.vector_store %arg8[%c0_159, %c0_160], %433 {strides = array<i32>} : memref<8x32xf32, #tpu.memory_space<vmem>>, vector<8x32xf32>,
    return
  }
}

</mosaic_0001>

<bundles_post_ra>
// kernel: tpu_custom_call.1
= control target key start
LH: loop header
LB: loop body
LE: loop exit
PB: predicated region body
PF: predicated region fallthrough
CT: control target
= control target key end

     0   :  { %13 = vsyncpa [#allocation3], 0  ;;  %s3563_s0 = inlined_call_operand.vmem [shape: f32[1,40], index: 0, kind: input, shape index: {}]   ;;  %s3564_s1 = inlined_call_operand.vmem [shape: f32[40,32], index: 1, kind: input, shape index: {}]   ;;  %s3565_s2 = inlined_call_operand.vmem [shape: f32[1,32], index: 2, kind: input, shape index: {}]   ;;  %s3566_s3 = inlined_call_operand.hbm [shape: f32[4,32,32], index: 3, kind: input, shape index: {}]   ;;  %s3567_s4 = inlined_call_operand.hbm [shape: f32[4,32,32], index: 4, kind: input, shape index: {}]   ;;  %s3568_s5 = inlined_call_operand.vmem [shape: f32[4,1,32], index: 5, kind: input, shape index: {}]   ;;  %s3569_s6 = inlined_call_operand.vmem [shape: f32[32,32], index: 6, kind: input, shape index: {}]   ;;  %s3570_s7 = inlined_call_operand.vmem [shape: f32[1,32], index: 7, kind: input, shape index: {}]   ;;  %s3571_s8 = inlined_call_operand.hbm [shape: f32[8,32], index: 8, kind: output, shape index: {}]  }
   0x1   :  { %14 = vsyncpa [#allocation6], 0 }
   0x2   :  { %15 = vsyncpa [#allocation4], 0  ;;  %s26_s29 = sshll.u32 %s3566_s3, 4  ;;  %s2753_s30 = smov [#allocation2]   ;;  %s27_s29 = int_to_ptr.hbm [resolvable:$true] %s26_s29 }
   0x3   :  { %s28_s9 = sshll.u32 %s2753_s30, 4  ;;  %s39_s12 = sshll.u32 %s3567_s4, 4  ;;  %s29_s9 = int_to_ptr.vmem [resolvable:$true] %s28_s9  ;;  %s40_s12 = int_to_ptr.hbm [resolvable:$true] %s39_s12 }
   0x4   :  { %s2754_s13 = smov 128   ;;  %s2755_s14 = smov 8  }
   0x5   :  { %34 = dma.hbm_to_vmem [thread:$0]  %s27_s29, 2048, %s29_s9, [#allocation3], %s2754_s13, %s2754_s13, %s2755_s14  }
   0x6   :  { %s2756_s15 = smov [#allocation5]  }
   0x7   :  { %s41_s16 = sshll.u32 %s2756_s15, 4  ;;  %s42_s16 = int_to_ptr.vmem [resolvable:$true] %s41_s16 }
   0x8   :  { %47 = dma.hbm_to_vmem [thread:$0]  %s40_s12, 2048, %s42_s16, [#allocation6], %s2754_s13, %s2754_s13, %s2755_s14  }
   0x9   :  { %2747 = dma.done.wait [#allocation3], 2048  }
   0xa   :  { %2748 = vsyncadd [#allocation3], 4294965248 }
   0xb   :  { %2749 = dma.done.wait [#allocation6], 2048  }
   0xc   :  { %2750 = vsyncadd [#allocation6], 4294965248  ;;  %v62_v0 = vlaneseq  ;;  %v119_v1 = vld [vmem:[%s3564_s1 + $0x20] sm:$0xff]  ;;  %v118_v2 = vld [vmem:[%s3564_s1 + $0x18] sm:$0xff]  ;;  %vm121_vm1 = vcmask 326656   ;;  %v3572_v16 = vmov 0.0  }
   0xd   :  { %136 = vmatpush.msra.mxu0 %v119_v1  ;;  %v117_v4 = vld [vmem:[%s3564_s1 + $0x10] sm:$0xff]  ;;  %v2821_v5 = vld [vmem:[#allocation2 + $0x18] sm:$0xff]  ;;  %v116_v9 = vld [vmem:[%s3564_s1 + $0x8] sm:$0xff]  ;;  %vm148_vm2 = vcmask 261120   ;;  %vm405_vm15 = vcmask 253952   ;;  %s2381_s14 = sshll.u32 %s3571_s8, 4  ;;  %s2382_s14 = int_to_ptr.hbm [resolvable:$true] %s2381_s14 }
   0xe   :  { %v2816_v3 = vand.u32 127, %v62_v0  ;;  %v2823_v6 = vld [vmem:[#allocation2 + $0x10] sm:$0xff]  ;;  %187 = vmatpush.msra.mxu2 %v2821_v5  ;;  %v2826_v7 = vld [vmem:[#allocation5 + $0x18] sm:$0xff]  ;;  %v2833_v10 = vld [vmem:[#allocation2 + $0x8] sm:$0xff] }
   0xf   :  { %137 = vmatpush.msra.mxu0 %v118_v2  ;;  %v2828_v8 = vld [vmem:[#allocation5 + $0x38] sm:$0xff]  ;;  %164 = vmatpush.msra.mxu1 %v2826_v7  ;;  %v2838_v11 = vld [vmem:[#allocation5 + $0x10] sm:$0xff]  ;;  %v115_v13 = vld [vmem:[%s3564_s1] sm:$0xff] }
  0x10   :  { %vm145_vm0 = vcmp.eq.s32.totalorder %v2816_v3, 0  ;;  %227 = vmatpush.msra.mxu3 %v2828_v8  ;;  %188 = vmatpush.msra.mxu2 %v2823_v6  ;;  %v2841_v12 = vld [vmem:[#allocation5 + $0x30] sm:$0xff]  ;;  %v2846_v14 = vld [vmem:[#allocation2] sm:$0xff]  ;;  %v2859_v18 = vld [vmem:[#allocation5 + $0x58] sm:$0xff] }
  0x11   :  { %138 = vmatpush.msra.mxu0 %v117_v4  ;;  %165 = vmatpush.msra.mxu1 %v2838_v11  ;;  %v114_v15 = vld [vmem:[%s3563_s0] sm:$0x1]  ;;  %v2857_v17 = vsel %vm145_vm0, 1.0, %v3572_v16  ;;  %v2861_v19 = vld [vmem:[#allocation5 + $0x78] sm:$0xff]  ;;  %v2866_v20 = vld [vmem:[#allocation5 + $0x50] sm:$0xff] }
  0x12   :  { %228 = vmatpush.msra.mxu3 %v2841_v12  ;;  %189 = vmatpush.msra.mxu2 %v2833_v10  ;;  %v2868_v21 = vld [vmem:[#allocation5 + $0x70] sm:$0xff]  ;;  %v2874_v22 = vld [vmem:[#allocation5 + $0x8] sm:$0xff]  ;;  %v2886_v26 = vld [vmem:[#allocation5] sm:$0xff] }
  0x13   :  { %139 = vmatpush.msra.mxu0 %v116_v9  ;;  %v2876_v23 = vld [vmem:[#allocation5 + $0x28] sm:$0xff]  ;;  %166 = vmatpush.msra.mxu1 %v2874_v22  ;;  %v2888_v27 = vld [vmem:[#allocation5 + $0x20] sm:$0xff]  ;;  %v2898_v30 = vld [vmem:[#allocation2 + $0x38] sm:$0xff] }
  0x14   :  { %190 = vmatpush.msra.mxu2 %v2846_v14  ;;  %v2878_v24 = vld [vmem:[#allocation5 + $0x48] sm:$0xff]  ;;  %229 = vmatpush.msra.mxu3 %v2876_v23  ;;  %v2890_v28 = vld [vmem:[#allocation5 + $0x40] sm:$0xff]  ;;  %v2901_v31 = vld [vmem:[#allocation2 + $0x58] sm:$0xff] }
  0x15   :  { %140 = vmatpush.msra.mxu0 %v115_v13  ;;  %2398 = vmatmul.msk.f32.vlgmr.msra.gmra.mxu2 %vm148_vm2, %v2857_v17  ;;  %v2882_v25 = vld [vmem:[#allocation5 + $0x68] sm:$0xff]  ;;  %v2894_v29 = vld [vmem:[#allocation5 + $0x60] sm:$0xff]  ;;  %v2903_v32 = vld [vmem:[#allocation2 + $0x30] sm:$0xff] }
  0x16   :  { %2395 = vmatmul.msk.f32.vlgmr.msra.gmra.mxu0 %vm121_vm1, %v114_v15  ;;  %287 = vmatpush.msrb.mxu2 %v2859_v18  ;;  %v2905_v33 = vld [vmem:[#allocation2 + $0x50] sm:$0xff]  ;;  %v2909_v34 = vld [vmem:[#allocation2 + $0x28] sm:$0xff]  ;;  %v2916_v36 = vld [vmem:[#allocation2 + $0x20] sm:$0xff] }
  0x17   :  { %329 = vmatpush.msrb.mxu0 %v2861_v19  ;;  %167 = vmatpush.msra.mxu1 %v2886_v26  ;;  %v2912_v35 = vld [vmem:[#allocation2 + $0x48] sm:$0xff]  ;;  %v2919_v37 = vld [vmem:[#allocation2 + $0x40] sm:$0xff]  ;;  %v2929_v41 = vld [vmem:[#allocation2 + $0x78] sm:$0xff] }
  0x18   :  { %288 = vmatpush.msrb.mxu2 %v2866_v20  ;;  %230 = vmatpush.msra.mxu3 %v2888_v27  ;;  %v120_v38 = vld [vmem:[%s3565_s2] sm:$0x1]  ;;  %v2935_v42 = vld [vmem:[#allocation2 + $0x70] sm:$0xff]  ;;  %v2939_v43 = vld [vmem:[#allocation2 + $0x68] sm:$0xff] }
  0x19   :  { %330 = vmatpush.msrb.mxu0 %v2868_v21  ;;  %247 = vmatpush.msrb.mxu1 %v2898_v30  ;;  %v2946_v44 = vld [vmem:[#allocation2 + $0x60] sm:$0xff]  ;;  %v2986_v58 = vld [vmem:[%s3569_s6 + $0x18] sm:$0xff]  ;;  %v2991_v59 = vld [vmem:[%s3569_s6 + $0x10] sm:$0xff] }
  0x1a   :  { %289 = vmatpush.msrb.mxu2 %v2878_v24  ;;  %307 = vmatpush.msrb.mxu3 %v2901_v31  ;;  %v2974_v46 = vld [vmem:[%s3568_s5] sm:$0x1]  ;;  %v2980_v52 = vld [vmem:[%s3568_s5 + $0x1] sm:$0x1]  ;;  %v2997_v61 = vld [vmem:[%s3569_s6 + $0x8] sm:$0xff] }
  0x1b   :  { %331 = vmatpush.msrb.mxu0 %v2882_v25  ;;  %248 = vmatpush.msrb.mxu1 %v2903_v32  ;;  %3597 = vst [vmem:[#allocation11_spill] sm:$0xff] %v2974_v46  ;;  %v3002_v63 = vld [vmem:[%s3568_s5 + $0x3] sm:$0x1] }
  0x1c   :  { %290 = vmatpush.msrb.mxu2 %v2890_v28  ;;  %308 = vmatpush.msrb.mxu3 %v2905_v33  ;;  %3598 = vst [vmem:[#allocation12_spill] sm:$0xff] %v2980_v52  ;;  %v3008_v2 = vld [vmem:[%s3569_s6] sm:$0xff] }
  0x1d   :  { %332 = vmatpush.msrb.mxu0 %v2894_v29  ;;  %249 = vmatpush.msrb.mxu1 %v2909_v34  ;;  %3599 = vst [vmem:[#allocation13_spill] sm:$0xff] %v3002_v63 }
  0x1e   :  { %309 = vmatpush.msrb.mxu3 %v2912_v35  ;;  %397 = vmatpush.msra.mxu2 %v2986_v58 }
  0x1f   :  { %464 = vmatpush.msra.mxu0 %v2821_v5  ;;  %250 = vmatpush.msrb.mxu1 %v2916_v36 }
  0x20   :  { %310 = vmatpush.msrb.mxu3 %v2919_v37  ;;  %398 = vmatpush.msra.mxu2 %v2991_v59 }
  0x21   :  { %465 = vmatpush.msra.mxu0 %v2823_v6 }
  0x22   :  { %399 = vmatpush.msra.mxu2 %v2997_v61 }
  0x23   :  { %466 = vmatpush.msra.mxu0 %v2833_v10 }
  0x24   :  { %400 = vmatpush.msra.mxu2 %v3008_v2 }
  0x25   :  { %467 = vmatpush.msra.mxu0 %v2846_v14 }
  0x93   :  { %v142_v39 = vpop.f32.mrf.mxu0 }
  0x94   :  { %v143_v40 = vadd.f32 %v142_v39, %v120_v38 }
  0x96   :  { %2397 = vmatmul.msk.f32.vlgmr.msra.gmra.mxu1 %vm148_vm2, %v143_v40  ;;  %2400 = vmatmul.msk.f32.vlgmr.msra.gmra.mxu3 %vm148_vm2, %v143_v40 }
  0x97   :  { %2403 = vmatmul.msk.f32.vlgmr.msrb.gmra.mxu2 %vm148_vm2, %v143_v40  ;;  %2405 = vmatmul.msk.f32.vlgmr.msrb.gmra.mxu0 %vm148_vm2, %v143_v40 }
  0x98   :  { %349 = vmatpush.msra.mxu1 %v2929_v41  ;;  %441 = vmatpush.msra.mxu3 %v2826_v7  ;;  %v192_v45 = vpop.f32.mrf.mxu2 }
  0x99   :  { %584 = vmatpush.msrb.mxu0 %v2901_v31  ;;  %524 = vmatpush.msrb.mxu2 %v2898_v30 }
  0x9a   :  { %350 = vmatpush.msra.mxu1 %v2935_v42  ;;  %442 = vmatpush.msra.mxu3 %v2838_v11 }
  0x9b   :  { %585 = vmatpush.msrb.mxu0 %v2905_v33  ;;  %525 = vmatpush.msrb.mxu2 %v2903_v32 }
  0x9c   :  { %351 = vmatpush.msra.mxu1 %v2939_v43  ;;  %443 = vmatpush.msra.mxu3 %v2874_v22 }
  0x9d   :  { %586 = vmatpush.msrb.mxu0 %v2912_v35  ;;  %526 = vmatpush.msrb.mxu2 %v2909_v34 }
  0x9e   :  { %2401 = vmatmul.msk.f32.vlgmr.msrb.gmra.mxu1 %vm148_vm2, %v2857_v17  ;;  %2404 = vmatmul.msk.f32.vlgmr.msrb.gmra.mxu3 %vm148_vm2, %v2857_v17 }
  0x9f   :  { %352 = vmatpush.msra.mxu1 %v2946_v44  ;;  %444 = vmatpush.msra.mxu3 %v2886_v26 }
  0xa0   :  { %587 = vmatpush.msrb.mxu0 %v2919_v37  ;;  %527 = vmatpush.msrb.mxu2 %v2916_v36 }
  0xa1   :  { %504 = vmatpush.msrb.mxu1 %v2828_v8  ;;  %564 = vmatpush.msrb.mxu3 %v2859_v18 }
  0xa3   :  { %505 = vmatpush.msrb.mxu1 %v2841_v12  ;;  %565 = vmatpush.msrb.mxu3 %v2866_v20 }
  0xa5   :  { %506 = vmatpush.msrb.mxu1 %v2876_v23  ;;  %566 = vmatpush.msrb.mxu3 %v2878_v24 }
  0xa6   :  { %2406 = vmatmul.msk.f32.vlgmr.msra.gmra.mxu1 %vm148_vm2, %v2857_v17 }
  0xa7   :  { %567 = vmatpush.msrb.mxu3 %v2890_v28  ;;  %507 = vmatpush.msrb.mxu1 %v2888_v27 }
  0xa9   :  { %606 = vmatpush.msra.mxu1 %v2861_v19 }
  0xab   :  { %607 = vmatpush.msra.mxu1 %v2868_v21 }
  0xad   :  { %608 = vmatpush.msra.mxu1 %v2882_v25 }
  0xaf   :  { %609 = vmatpush.msra.mxu1 %v2894_v29 }
 0x113   :  { %v169_v47 = vpop.f32.mrf.mxu1 }
 0x114   :  { %v193_v48 = vadd.f32 %v192_v45, %v169_v47  ;;  %v334_v62 = vpop.f32.mrf.mxu0 }
 0x116   :  { %v195_v49 = vadd.f32 %v193_v48, %v2974_v46  ;;  %v3019_v48 = vld [vmem:[%s3568_s5 + $0x2] sm:$0x1] }
 0x117   :  { %3600 = vst [vmem:[#allocation14_spill] sm:$0xff] %v3019_v48 }
 0x118   :  { %v2399_v50 = vmul.f32 -1.442695, %v195_v49 }
 0x119   :  { %v232_v51 = vpop.f32.mrf.mxu3 }
 0x11a   :  { %2506 = vpow2.f32 %v2399_v50  ;;  %v292_v45 = vpop.f32.mrf.mxu2 }
 0x11b   :  { %v252_v53 = vpop.f32.mrf.mxu1 }
 0x11c   :  { %v253_v54 = vadd.f32 %v252_v53, %v232_v51 }
 0x11e   :  { %v255_v55 = vadd.f32 %v2980_v52, %v253_v54 }
 0x120   :  { %v2507_v56 = vpop.eup %2506  ;;  %v2402_v57 = vmul.f32 -1.442695, %v255_v55 }
 0x121   :  { %v199_v60 = vadd.f32 1.0, %v2507_v56  ;;  %v312_v39 = vpop.f32.mrf.mxu3 }
 0x122   :  { %2508 = vpow2.f32 %v2402_v57  ;;  %v313_v47 = vadd.f32 %v312_v39, %v292_v45 }
 0x123   :  { %2510 = vrcp.f32 %v199_v60  ;;  %v354_v0 = vpop.f32.mrf.mxu1  ;;  %v211_v57 = vand.u32 2147483648, %v199_v60  ;;  %vm205_vm4 = vweird.f32 %v199_v60 }
 0x124   :  { %v355_v1 = vadd.f32 %v354_v0, %v334_v62  ;;  %v315_v53 = vadd.f32 %v3019_v48, %v313_v47  ;;  %v209_v0 = vand.u32 2147483647, %v199_v60 }
 0x126   :  { %v357_v4 = vadd.f32 %v3002_v63, %v355_v1  ;;  %vm210_vm8 = vcmp.eq.f32.partialorder %v209_v0, 8.507059e+37 }
 0x128   :  { %v2509_v9 = vpop.eup %2508  ;;  %v2407_v13 = vmul.f32 -1.442695, %v357_v4 }
 0x129   :  { %v2511_v15 = vpop.eup %2510  ;;  %v259_v17 = vadd.f32 1.0, %v2509_v9 }
 0x12a   :  { %v201_v38 = vmul.f32 %v2511_v15, %v199_v60  ;;  %2512 = vpow2.f32 %v2407_v13  ;;  %vm206_vm3 = vweird.f32 %v2511_v15 }
 0x12b   :  { %2514 = vrcp.f32 %v259_v17  ;;  %v271_v1 = vand.u32 2147483648, %v259_v17  ;;  %vm207_vm5 = vmor %vm205_vm4, %vm206_vm3  ;;  %v269_v13 = vand.u32 2147483647, %v259_v17  ;;  %vm265_vm7 = vweird.f32 %v259_v17 }
 0x12c   :  { %v202_v40 = vsub.f32 1.0, %v201_v38  ;;  %v212_v38 = vor.u32 1.1754944e-38, %v211_v57 }
 0x12d   :  { %v272_v45 = vor.u32 1.1754944e-38, %v271_v1  ;;  %vm270_vm10 = vcmp.eq.f32.partialorder %v269_v13, 8.507059e+37 }
 0x12e   :  { %v203_v49 = vmul.f32 %v2511_v15, %v202_v40 }
 0x130   :  { %v2513_v50 = vpop.eup %2512  ;;  %v204_v56 = vadd.f32 %v2511_v15, %v203_v49 }
 0x131   :  { %v2515_v51 = vpop.eup %2514  ;;  %v361_v54 = vadd.f32 1.0, %v2513_v50 }
 0x132   :  { %v261_v55 = vmul.f32 %v2515_v51, %v259_v17  ;;  %v208_v9 = vsel %vm207_vm5, %v2511_v15, %v204_v56  ;;  %vm266_vm6 = vweird.f32 %v2515_v51 }
 0x133   :  { %2516 = vrcp.f32 %v361_v54  ;;  %v213_v47 = vsel %vm210_vm8, %v212_v38, %v208_v9  ;;  %vm267_vm9 = vmor %vm265_vm7, %vm266_vm6  ;;  %v373_v17 = vand.u32 2147483648, %v361_v54  ;;  %vm367_vm12 = vweird.f32 %v361_v54 }
 0x134   :  { %v262_v62 = vsub.f32 1.0, %v261_v55  ;;  %2518 = vtanh.f32 %v315_v53  ;;  %v371_v57 = vand.u32 2147483647, %v361_v54 }
 0x136   :  { %v263_v4 = vmul.f32 %v2515_v51, %v262_v62  ;;  %vm372_vm14 = vcmp.eq.f32.partialorder %v371_v57, 8.507059e+37 }
 0x138   :  { %v264_v39 = vadd.f32 %v2515_v51, %v263_v4 }
 0x139   :  { %v2517_v40 = vpop.eup %2516 }
 0x13a   :  { %v268_v49 = vsel %vm267_vm9, %v2515_v51, %v264_v39  ;;  %v363_v50 = vmul.f32 %v2517_v40, %v361_v54  ;;  %v2519_v55 = vpop.eup %2518  ;;  %vm368_vm11 = vweird.f32 %v2517_v40  ;;  %v374_v51 = vor.u32 1.1754944e-38, %v373_v17 }
 0x13b   :  { %v273_v60 = vsel %vm270_vm10, %v272_v45, %v268_v49  ;;  %v378_v48 = vmul.f32 %v2519_v55, %v213_v47  ;;  %vm369_vm13 = vmor %vm367_vm12, %vm368_vm11 }
 0x13c   :  { %v377_v16 = vmul.f32 0.0, %v273_v60  ;;  %v364_v53 = vsub.f32 1.0, %v363_v50 }
 0x13e   :  { %v3023_v62 = vadd.f32 %v378_v48, %v377_v16  ;;  %v365_v15 = vmul.f32 %v2517_v40, %v364_v53  ;;  %v3054_v16 = vld [vmem:[%s3570_s7] sm:$0x1] }
 0x140   :  { %2520 = vtanh.f32 %v3023_v62  ;;  %v366_v56 = vadd.f32 %v2517_v40, %v365_v15 }
 0x142   :  { %v370_v0 = vsel %vm369_vm13, %v2517_v40, %v366_v56 }
 0x143   :  { %v375_v4 = vsel %vm372_vm14, %v374_v51, %v370_v0  ;;  %v3602_v0 = vmov 0.0  }
 0x146   :  { %v2521_v1 = vpop.eup %2520 }
 0x147   :  { %v381_v9 = vmul.f32 %v2521_v1, %v375_v4 }
 0x149   :  { %2408 = vmatmul.msk.f32.vlgmr.msra.gmra.mxu2 %vm148_vm2, %v381_v9  ;;  %2410 = vmatmul.msk.f32.vlgmr.msra.gmra.mxu3 %vm148_vm2, %v381_v9 }
 0x14a   :  { %2413 = vmatmul.msk.f32.vlgmr.msrb.gmra.mxu1 %vm148_vm2, %v381_v9  ;;  %626 = vmatpush.msra.mxu2 %v2929_v41 }
 0x14b   :  { %674 = vmatpush.msra.mxu3 %v2986_v58  ;;  %740 = vmatpush.msrb.mxu1 %v2821_v5 }
 0x14c   :  { %627 = vmatpush.msra.mxu2 %v2935_v42 }
 0x14d   :  { %675 = vmatpush.msra.mxu3 %v2991_v59  ;;  %741 = vmatpush.msrb.mxu1 %v2823_v6 }
 0x14e   :  { %628 = vmatpush.msra.mxu2 %v2939_v43 }
 0x14f   :  { %676 = vmatpush.msra.mxu3 %v2997_v61  ;;  %742 = vmatpush.msrb.mxu1 %v2833_v10 }
 0x150   :  { %629 = vmatpush.msra.mxu2 %v2946_v44 }
 0x151   :  { %2416 = vmatmul.msk.f32.vlgmr.msrb.gmra.mxu3 %vm148_vm2, %v381_v9  ;;  %743 = vmatpush.msrb.mxu1 %v2846_v14 }
 0x152   :  { %2418 = vmatmul.msk.f32.vlgmr.msra.gmra.mxu1 %vm148_vm2, %v381_v9  ;;  %677 = vmatpush.msra.mxu3 %v3008_v2 }
 0x153   :  { %860 = vmatpush.msra.mxu1 %v2901_v31 }
 0x154   :  { %800 = vmatpush.msrb.mxu3 %v2898_v30 }
 0x155   :  { %861 = vmatpush.msra.mxu1 %v2905_v33 }
 0x156   :  { %801 = vmatpush.msrb.mxu3 %v2903_v32 }
 0x157   :  { %862 = vmatpush.msra.mxu1 %v2912_v35 }
 0x158   :  { %802 = vmatpush.msrb.mxu3 %v2909_v34 }
 0x159   :  { %863 = vmatpush.msra.mxu1 %v2919_v37 }
 0x15a   :  { %803 = vmatpush.msrb.mxu3 %v2916_v36 }
 0x1cc   :  { %v402_v48 = vpop.f32.mrf.mxu2  ;;  %v446_v1 = vpop.f32.mrf.mxu3 }
 0x1cd   :  { %v3057_v54 = vadd.f32 %v402_v48, %v3054_v16 }
 0x1cf   :  { %3601 = vst [vmem:[#allocation15_spill] sm:$0xff] %v3057_v54  ;;  %v406_v13 = vsel %vm405_vm15, %v3057_v54, -inf }
 0x1d0   :  { %407 = vmax.xlane.f32.xlu0 %v406_v13  ;;  %v509_v13 = vpop.f32.mrf.mxu1 }
 0x243   :  { %v408_v38 = vpop.xlane.xlu0 %407 }
 0x244   :  { %vm409_vm0 = vcmp.eq.f32.partialorder %v3057_v54, %v408_v38 }
 0x245   :  { %v410_v39 = vsel %vm409_vm0, %v2816_v3, 32 }
 0x246   :  { %v411_v40 = vsel %vm405_vm15, %v410_v39, 2147483647 }
 0x247   :  { %v413_v45 = vshra.s32 %v411_v40, 16  ;;  %v412_v49 = vand.u32 65535, %v411_v40 }
 0x249   :  { %v415_v47 = vcvt.s32.f32 %v413_v45  ;;  %v414_v55 = vcvt.s32.f32 %v412_v49 }
 0x24b   :  { %416 = vmin.xlane.f32.xlu0 %v415_v47 }
 0x2be   :  { %v417_v50 = vpop.xlane.xlu0 %416 }
 0x2bf   :  { %vm418_vm1 = vcmp.eq.f32.partialorder %v415_v47, %v417_v50  ;;  %v423_v53 = vcvt.f32.s32 %v417_v50  ;;  %v611_v50 = vpop.f32.mrf.mxu1 }
 0x2c0   :  { %v419_v60 = vsel %vm418_vm1, %v414_v55, inf }
 0x2c1   :  { %420 = vmin.xlane.f32.xlu1 %v419_v60  ;;  %v424_v17 = vshll.u32 %v423_v53, 16 }
 0x334   :  { %v421_v15 = vpop.xlane.xlu1 %420 }
 0x335   :  { %v422_v56 = vcvt.f32.s32 %v421_v15 }
 0x337   :  { %v425_v57 = vadd.s32 %v424_v17, %v422_v56 }
 0x339   :  { %vm426_vm3 = vcmp.eq.s32.totalorder %v2816_v3, %v425_v57 }
 0x33a   :  { %v2409_v51 = vsel %vm426_vm3, 1.0, %v3602_v0 }
 0x33b   :  { %2411 = vmatmul.msk.f32.vlgmr.msra.gmra.mxu0 %vm148_vm2, %v2409_v51  ;;  %2414 = vmatmul.msk.f32.vlgmr.msrb.gmra.mxu2 %vm148_vm2, %v2409_v51 }
 0x33c   :  { %717 = vmatpush.msra.mxu0 %v2826_v7  ;;  %780 = vmatpush.msrb.mxu2 %v2828_v8 }
 0x33e   :  { %718 = vmatpush.msra.mxu0 %v2838_v11  ;;  %781 = vmatpush.msrb.mxu2 %v2841_v12 }
 0x340   :  { %719 = vmatpush.msra.mxu0 %v2874_v22  ;;  %782 = vmatpush.msrb.mxu2 %v2876_v23 }
 0x342   :  { %720 = vmatpush.msra.mxu0 %v2886_v26  ;;  %783 = vmatpush.msrb.mxu2 %v2888_v27 }
 0x343   :  { %2417 = vmatmul.msk.f32.vlgmr.msrb.gmra.mxu0 %vm148_vm2, %v2409_v51  ;;  %2419 = vmatmul.msk.f32.vlgmr.msra.gmra.mxu2 %vm148_vm2, %v2409_v51 }
 0x344   :  { %840 = vmatpush.msrb.mxu0 %v2859_v18  ;;  %882 = vmatpush.msra.mxu2 %v2861_v19 }
 0x346   :  { %841 = vmatpush.msrb.mxu0 %v2866_v20  ;;  %883 = vmatpush.msra.mxu2 %v2868_v21 }
 0x348   :  { %842 = vmatpush.msrb.mxu0 %v2878_v24  ;;  %884 = vmatpush.msra.mxu2 %v2882_v25 }
 0x34a   :  { %843 = vmatpush.msrb.mxu0 %v2890_v28  ;;  %885 = vmatpush.msra.mxu2 %v2894_v29 }
 0x3b8   :  { %v469_v4 = vpop.f32.mrf.mxu0 }
 0x3b9   :  { %v470_v9 = vadd.f32 %v469_v4, %v446_v1  ;;  %v569_v4 = vpop.f32.mrf.mxu3 }
 0x3bb   :  { %v472_v48 = vadd.f32 %v470_v9, %v2974_v46 }
 0x3bd   :  { %v2412_v38 = vmul.f32 -1.442695, %v472_v48 }
 0x3be   :  { %v529_v39 = vpop.f32.mrf.mxu2 }
 0x3bf   :  { %2522 = vpow2.f32 %v2412_v38  ;;  %v530_v40 = vadd.f32 %v529_v39, %v509_v13 }
 0x3c0   :  { %v589_v51 = vpop.f32.mrf.mxu0 }
 0x3c1   :  { %v532_v45 = vadd.f32 %v2980_v52, %v530_v40  ;;  %v590_v48 = vadd.f32 %v589_v51, %v569_v4 }
 0x3c3   :  { %v2415_v47 = vmul.f32 -1.442695, %v532_v45  ;;  %v3603_v45 = vld [vmem:[#allocation14_spill] sm:$0xff] }
 0x3c5   :  { %v2523_v49 = vpop.eup %2522  ;;  %2524 = vpow2.f32 %v2415_v47  ;;  %v592_v47 = vadd.f32 %v3603_v45, %v590_v48 }
 0x3c6   :  { %v476_v55 = vadd.f32 1.0, %v2523_v49  ;;  %v631_v60 = vpop.f32.mrf.mxu2 }
 0x3c7   :  { %v632_v53 = vadd.f32 %v631_v60, %v611_v50 }
 0x3c8   :  { %2526 = vrcp.f32 %v476_v55  ;;  %vm482_vm5 = vweird.f32 %v476_v55 }
 0x3c9   :  { %v634_v15 = vadd.f32 %v3002_v63, %v632_v53  ;;  %v488_v53 = vand.u32 2147483648, %v476_v55 }
 0x3cb   :  { %v2525_v17 = vpop.eup %2524  ;;  %v2420_v56 = vmul.f32 -1.442695, %v634_v15 }
 0x3cc   :  { %v536_v57 = vadd.f32 1.0, %v2525_v17  ;;  %v486_v17 = vand.u32 2147483647, %v476_v55 }
 0x3cd   :  { %2528 = vpow2.f32 %v2420_v56 }
 0x3ce   :  { %v2527_v1 = vpop.eup %2526  ;;  %2530 = vrcp.f32 %v536_v57  ;;  %v548_v56 = vand.u32 2147483648, %v536_v57  ;;  %v546_v4 = vand.u32 2147483647, %v536_v57  ;;  %vm542_vm8 = vweird.f32 %v536_v57 }
 0x3cf   :  { %v478_v9 = vmul.f32 %v2527_v1, %v476_v55  ;;  %vm483_vm4 = vweird.f32 %v2527_v1  ;;  %vm487_vm9 = vcmp.eq.f32.partialorder %v486_v17, 8.507059e+37 }
 0x3d0   :  { %vm484_vm6 = vmor %vm482_vm5, %vm483_vm4  ;;  %vm547_vm11 = vcmp.eq.f32.partialorder %v546_v4, 8.507059e+37 }
 0x3d1   :  { %v479_v13 = vsub.f32 1.0, %v478_v9  ;;  %v489_v9 = vor.u32 1.1754944e-38, %v488_v53 }
 0x3d3   :  { %v2529_v38 = vpop.eup %2528  ;;  %v480_v39 = vmul.f32 %v2527_v1, %v479_v13 }
 0x3d4   :  { %v2531_v40 = vpop.eup %2530  ;;  %v638_v49 = vadd.f32 1.0, %v2529_v38  ;;  %v549_v38 = vor.u32 1.1754944e-38, %v548_v56 }
 0x3d5   :  { %v538_v50 = vmul.f32 %v2531_v40, %v536_v57  ;;  %v481_v60 = vadd.f32 %v2527_v1, %v480_v39  ;;  %vm543_vm7 = vweird.f32 %v2531_v40 }
 0x3d6   :  { %2532 = vrcp.f32 %v638_v49  ;;  %vm544_vm10 = vmor %vm542_vm8, %vm543_vm7  ;;  %vm644_vm13 = vweird.f32 %v638_v49 }
 0x3d7   :  { %v539_v15 = vsub.f32 1.0, %v538_v50  ;;  %2534 = vtanh.f32 %v592_v47  ;;  %v485_v51 = vsel %vm484_vm6, %v2527_v1, %v481_v60  ;;  %v648_v60 = vand.u32 2147483647, %v638_v49 }
 0x3d8   :  { %v490_v39 = vsel %vm487_vm9, %v489_v9, %v485_v51 }
 0x3d9   :  { %v540_v54 = vmul.f32 %v2531_v40, %v539_v15  ;;  %vm649_vm0 = vcmp.eq.f32.partialorder %v648_v60, 8.507059e+37 }
 0x3db   :  { %v541_v48 = vadd.f32 %v2531_v40, %v540_v54  ;;  %v650_v54 = vand.u32 2147483648, %v638_v49 }
 0x3dc   :  { %v2533_v13 = vpop.eup %2532 }
 0x3dd   :  { %v545_v45 = vsel %vm544_vm10, %v2531_v40, %v541_v48  ;;  %v640_v50 = vmul.f32 %v2533_v13, %v638_v49  ;;  %v2535_v63 = vpop.eup %2534  ;;  %vm645_vm12 = vweird.f32 %v2533_v13  ;;  %v651_v53 = vor.u32 1.1754944e-38, %v650_v54 }
 0x3de   :  { %v550_v55 = vsel %vm547_vm11, %v549_v38, %v545_v45  ;;  %v655_v47 = vmul.f32 %v2535_v63, %v490_v39  ;;  %vm646_vm14 = vmor %vm644_vm13, %vm645_vm12 }
 0x3df   :  { %v654_v52 = vmul.f32 %v550_v55, %v3023_v62  ;;  %v641_v15 = vsub.f32 1.0, %v640_v50 }
 0x3e1   :  { %v3091_v46 = vadd.f32 %v655_v47, %v654_v52  ;;  %v642_v1 = vmul.f32 %v2533_v13, %v641_v15 }
 0x3e3   :  { %2536 = vtanh.f32 %v3091_v46  ;;  %v643_v57 = vadd.f32 %v2533_v13, %v642_v1 }
 0x3e5   :  { %v647_v40 = vsel %vm646_vm14, %v2533_v13, %v643_v57 }
 0x3e6   :  { %v652_v45 = vsel %vm649_vm0, %v651_v53, %v647_v40 }
 0x3e9   :  { %v2537_v17 = vpop.eup %2536 }
 0x3ea   :  { %v658_v56 = vmul.f32 %v2537_v17, %v652_v45 }
 0x3ec   :  { %2421 = vmatmul.msk.f32.vlgmr.msra.gmra.mxu3 %vm148_vm2, %v658_v56  ;;  %2423 = vmatmul.msk.f32.vlgmr.msra.gmra.mxu0 %vm148_vm2, %v658_v56 }
 0x3ed   :  { %2426 = vmatmul.msk.f32.vlgmr.msrb.gmra.mxu2 %vm148_vm2, %v658_v56  ;;  %902 = vmatpush.msra.mxu3 %v2929_v41 }
 0x3ee   :  { %950 = vmatpush.msra.mxu0 %v2986_v58  ;;  %1016 = vmatpush.msrb.mxu2 %v2821_v5 }
 0x3ef   :  { %903 = vmatpush.msra.mxu3 %v2935_v42 }
 0x3f0   :  { %951 = vmatpush.msra.mxu0 %v2991_v59  ;;  %1017 = vmatpush.msrb.mxu2 %v2823_v6 }
 0x3f1   :  { %904 = vmatpush.msra.mxu3 %v2939_v43 }
 0x3f2   :  { %952 = vmatpush.msra.mxu0 %v2997_v61  ;;  %1018 = vmatpush.msrb.mxu2 %v2833_v10 }
 0x3f3   :  { %905 = vmatpush.msra.mxu3 %v2946_v44 }
 0x3f4   :  { %2429 = vmatmul.msk.f32.vlgmr.msrb.gmra.mxu0 %vm148_vm2, %v658_v56  ;;  %1019 = vmatpush.msrb.mxu2 %v2846_v14 }
 0x3f5   :  { %2431 = vmatmul.msk.f32.vlgmr.msra.gmra.mxu2 %vm148_vm2, %v658_v56  ;;  %953 = vmatpush.msra.mxu0 %v3008_v2 }
 0x3f6   :  { %1136 = vmatpush.msra.mxu2 %v2901_v31 }
 0x3f7   :  { %1076 = vmatpush.msrb.mxu0 %v2898_v30 }
 0x3f8   :  { %1137 = vmatpush.msra.mxu2 %v2905_v33 }
 0x3f9   :  { %1077 = vmatpush.msrb.mxu0 %v2903_v32 }
 0x3fa   :  { %1138 = vmatpush.msra.mxu2 %v2912_v35 }
 0x3fb   :  { %1078 = vmatpush.msrb.mxu0 %v2909_v34 }
 0x3fc   :  { %1139 = vmatpush.msra.mxu2 %v2919_v37 }
 0x3fd   :  { %1079 = vmatpush.msrb.mxu0 %v2916_v36 }
 0x46f   :  { %v679_v5 = vpop.f32.mrf.mxu3 }
 0x470   :  { %v3120_v6 = vadd.f32 %v679_v5, %v3054_v16 }
 0x472   :  { %3604 = vst [vmem:[#allocation16_spill] sm:$0xff] %v3120_v6  ;;  %v682_v10 = vsel %vm405_vm15, %v3120_v6, -inf }
 0x473   :  { %683 = vmax.xlane.f32.xlu1 %v682_v10 }
 0x4e6   :  { %v684_v52 = vpop.xlane.xlu1 %683 }
 0x4e7   :  { %vm685_vm1 = vcmp.eq.f32.partialorder %v3120_v6, %v684_v52 }
 0x4e8   :  { %v686_v63 = vsel %vm685_vm1, %v2816_v3, 32 }
 0x4e9   :  { %v687_v62 = vsel %vm405_vm15, %v686_v63, 2147483647 }
 0x4ea   :  { %v689_v49 = vshra.s32 %v687_v62, 16  ;;  %v688_v4 = vand.u32 65535, %v687_v62 }
 0x4ec   :  { %v691_v51 = vcvt.s32.f32 %v689_v49  ;;  %v690_v48 = vcvt.s32.f32 %v688_v4 }
 0x4ee   :  { %692 = vmin.xlane.f32.xlu2 %v691_v51 }
 0x561   :  { %v693_v9 = vpop.xlane.xlu2 %692 }
 0x562   :  { %vm694_vm3 = vcmp.eq.f32.partialorder %v691_v51, %v693_v9  ;;  %v699_v38 = vcvt.f32.s32 %v693_v9  ;;  %v3608_v51 = vld [vmem:[#allocation14_spill] sm:$0xff] }
 0x563   :  { %v695_v13 = vsel %vm694_vm3, %v690_v48, inf }
 0x564   :  { %696 = vmin.xlane.f32.xlu2 %v695_v13  ;;  %v700_v50 = vshll.u32 %v699_v38, 16 }
 0x5d7   :  { %v697_v39 = vpop.xlane.xlu2 %696 }
 0x5d8   :  { %v698_v55 = vcvt.f32.s32 %v697_v39 }
 0x5da   :  { %v701_v47 = vadd.s32 %v700_v50, %v698_v55 }
 0x5dc   :  { %vm702_vm4 = vcmp.eq.s32.totalorder %v2816_v3, %v701_v47 }
 0x5dd   :  { %v2422_v15 = vsel %vm702_vm4, 1.0, %v3602_v0 }
 0x5de   :  { %2424 = vmatmul.msk.f32.vlgmr.msrb.gmra.mxu1 %vm148_vm2, %v2422_v15  ;;  %2427 = vmatmul.msk.f32.vlgmr.msrb.gmra.mxu3 %vm148_vm2, %v2422_v15 }
 0x5df   :  { %993 = vmatpush.msrb.mxu1 %v2826_v7  ;;  %1056 = vmatpush.msrb.mxu3 %v2828_v8  ;;  %v722_v7 = vpop.f32.mrf.mxu0 }
 0x5e1   :  { %994 = vmatpush.msrb.mxu1 %v2838_v11  ;;  %1057 = vmatpush.msrb.mxu3 %v2841_v12  ;;  %v3605_v12 = vld [vmem:[#allocation11_spill] sm:$0xff] }
 0x5e3   :  { %995 = vmatpush.msrb.mxu1 %v2874_v22  ;;  %1058 = vmatpush.msrb.mxu3 %v2876_v23 }
 0x5e5   :  { %996 = vmatpush.msrb.mxu1 %v2886_v26  ;;  %1059 = vmatpush.msrb.mxu3 %v2888_v27  ;;  %v3606_v26 = vld [vmem:[#allocation12_spill] sm:$0xff] }
 0x5e6   :  { %2430 = vmatmul.msk.f32.vlgmr.msra.gmra.mxu1 %vm148_vm2, %v2422_v15  ;;  %2432 = vmatmul.msk.f32.vlgmr.msra.gmra.mxu3 %vm148_vm2, %v2422_v15 }
 0x5e7   :  { %1116 = vmatpush.msra.mxu1 %v2859_v18  ;;  %1158 = vmatpush.msra.mxu3 %v2861_v19  ;;  %v785_v18 = vpop.f32.mrf.mxu2  ;;  %v845_v56 = vpop.f32.mrf.mxu0 }
 0x5e9   :  { %1117 = vmatpush.msra.mxu1 %v2866_v20  ;;  %1159 = vmatpush.msra.mxu3 %v2868_v21 }
 0x5eb   :  { %1118 = vmatpush.msra.mxu1 %v2878_v24  ;;  %1160 = vmatpush.msra.mxu3 %v2882_v25 }
 0x5ed   :  { %1119 = vmatpush.msra.mxu1 %v2890_v28  ;;  %1161 = vmatpush.msra.mxu3 %v2894_v29  ;;  %v3607_v29 = vld [vmem:[#allocation13_spill] sm:$0xff] }
 0x5ef   :  { %v887_v25 = vpop.f32.mrf.mxu2 }
 0x65b   :  { %v745_v8 = vpop.f32.mrf.mxu1 }
 0x65c   :  { %v746_v11 = vadd.f32 %v745_v8, %v722_v7 }
 0x65e   :  { %v748_v22 = vadd.f32 %v746_v11, %v3605_v12 }
 0x660   :  { %v2425_v23 = vmul.f32 -1.442695, %v748_v22 }
 0x661   :  { %v805_v19 = vpop.f32.mrf.mxu3 }
 0x662   :  { %2538 = vpow2.f32 %v2425_v23  ;;  %v806_v20 = vadd.f32 %v805_v19, %v785_v18 }
 0x663   :  { %v865_v17 = vpop.f32.mrf.mxu1 }
 0x664   :  { %v808_v21 = vadd.f32 %v3606_v26, %v806_v20  ;;  %v866_v10 = vadd.f32 %v865_v17, %v845_v56 }
 0x666   :  { %v2428_v27 = vmul.f32 -1.442695, %v808_v21  ;;  %v868_v4 = vadd.f32 %v3608_v51, %v866_v10  ;;  %v3167_v10 = vld [vmem:[#allocation2 + $0x10] sm:$0xff] }
 0x668   :  { %v2539_v24 = vpop.eup %2538  ;;  %2540 = vpow2.f32 %v2428_v27 }
 0x669   :  { %v752_v1 = vadd.f32 1.0, %v2539_v24  ;;  %v907_v28 = vpop.f32.mrf.mxu3 }
 0x66a   :  { %v908_v54 = vadd.f32 %v907_v28, %v887_v25 }
 0x66b   :  { %2542 = vrcp.f32 %v752_v1  ;;  %v764_v38 = vand.u32 2147483648, %v752_v1  ;;  %vm758_vm6 = vweird.f32 %v752_v1  ;;  %v762_v50 = vand.u32 2147483647, %v752_v1 }
 0x66c   :  { %v910_v57 = vadd.f32 %v3607_v29, %v908_v54 }
 0x66d   :  { %v765_v8 = vor.u32 1.1754944e-38, %v764_v38  ;;  %vm763_vm10 = vcmp.eq.f32.partialorder %v762_v50, 8.507059e+37  ;;  %v3218_v38 = vld [vmem:[#allocation5] sm:$0xff]  ;;  %v3226_v50 = vld [vmem:[#allocation5 + $0x58] sm:$0xff] }
 0x66e   :  { %v2541_v60 = vpop.eup %2540  ;;  %v2433_v40 = vmul.f32 -1.442695, %v910_v57 }
 0x66f   :  { %v812_v53 = vadd.f32 1.0, %v2541_v60 }
 0x670   :  { %2544 = vpow2.f32 %v2433_v40 }
 0x671   :  { %v2543_v45 = vpop.eup %2542  ;;  %2546 = vrcp.f32 %v812_v53  ;;  %v824_v55 = vand.u32 2147483648, %v812_v53  ;;  %v822_v7 = vand.u32 2147483647, %v812_v53  ;;  %vm818_vm9 = vweird.f32 %v812_v53 }
 0x672   :  { %v754_v5 = vmul.f32 %v2543_v45, %v752_v1  ;;  %vm759_vm5 = vweird.f32 %v2543_v45 }
 0x673   :  { %vm760_vm7 = vmor %vm758_vm6, %vm759_vm5  ;;  %v825_v18 = vor.u32 1.1754944e-38, %v824_v55  ;;  %vm823_vm12 = vcmp.eq.f32.partialorder %v822_v7, 8.507059e+37  ;;  %v3229_v55 = vld [vmem:[#allocation5 + $0x78] sm:$0xff]  ;;  %v3238_v7 = vld [vmem:[#allocation5 + $0x48] sm:$0xff] }
 0x674   :  { %v755_v52 = vsub.f32 1.0, %v754_v5 }
 0x676   :  { %v2545_v63 = vpop.eup %2544  ;;  %v756_v62 = vmul.f32 %v2543_v45, %v755_v52  ;;  %v3172_v52 = vld [vmem:[#allocation2 + $0x8] sm:$0xff] }
 0x677   :  { %v2547_v49 = vpop.eup %2546  ;;  %v914_v9 = vadd.f32 1.0, %v2545_v63 }
 0x678   :  { %v814_v48 = vmul.f32 %v2547_v49, %v812_v53  ;;  %v757_v13 = vadd.f32 %v2543_v45, %v756_v62  ;;  %vm819_vm8 = vweird.f32 %v2547_v49  ;;  %v3200_v62 = vld [vmem:[#allocation5 + $0x18] sm:$0xff] }
 0x679   :  { %2548 = vrcp.f32 %v914_v9  ;;  %vm820_vm11 = vmor %vm818_vm9, %vm819_vm8  ;;  %v926_v57 = vand.u32 2147483648, %v914_v9  ;;  %vm920_vm14 = vweird.f32 %v914_v9  ;;  %v924_v40 = vand.u32 2147483647, %v914_v9 }
 0x67a   :  { %v815_v39 = vsub.f32 1.0, %v814_v48  ;;  %2550 = vtanh.f32 %v868_v4  ;;  %v761_v15 = vsel %vm760_vm7, %v2543_v45, %v757_v13  ;;  %v3206_v4 = vld [vmem:[#allocation5 + $0x10] sm:$0xff]  ;;  %v3212_v48 = vld [vmem:[#allocation5 + $0x8] sm:$0xff] }
 0x67b   :  { %v766_v23 = vsel %vm763_vm10, %v765_v8, %v761_v15  ;;  %v927_v17 = vor.u32 1.1754944e-38, %v926_v57  ;;  %vm925_vm1 = vcmp.eq.f32.partialorder %v924_v40, 8.507059e+37  ;;  %v3215_v13 = vld [vmem:[#allocation5 + $0x28] sm:$0xff]  ;;  %v3235_v15 = vld [vmem:[#allocation5 + $0x70] sm:$0xff] }
 0x67c   :  { %v816_v47 = vmul.f32 %v2547_v49, %v815_v39  ;;  %v3221_v39 = vld [vmem:[#allocation5 + $0x20] sm:$0xff]  ;;  %v3241_v8 = vld [vmem:[#allocation5 + $0x68] sm:$0xff] }
 0x67e   :  { %v817_v11 = vadd.f32 %v2547_v49, %v816_v47  ;;  %v3232_v47 = vld [vmem:[#allocation5 + $0x50] sm:$0xff] }
 0x67f   :  { %v2549_v22 = vpop.eup %2548 }
 0x680   :  { %v821_v19 = vsel %vm820_vm11, %v2547_v49, %v817_v11  ;;  %v916_v20 = vmul.f32 %v2549_v22, %v914_v9  ;;  %v2551_v21 = vpop.eup %2550  ;;  %vm921_vm13 = vweird.f32 %v2549_v22  ;;  %v3203_v49 = vld [vmem:[#allocation5 + $0x38] sm:$0xff]  ;;  %v3209_v9 = vld [vmem:[#allocation5 + $0x30] sm:$0xff]  ;;  %v3244_v11 = vld [vmem:[#allocation5 + $0x40] sm:$0xff] }
 0x681   :  { %v826_v27 = vsel %vm823_vm12, %v825_v18, %v821_v19  ;;  %v931_v25 = vmul.f32 %v2551_v21, %v766_v23  ;;  %vm922_vm0 = vmor %vm920_vm14, %vm921_vm13 }
 0x682   :  { %v930_v24 = vmul.f32 %v826_v27, %v3091_v46  ;;  %v917_v1 = vsub.f32 1.0, %v916_v20  ;;  %v3162_v46 = vld [vmem:[#allocation2 + $0x18] sm:$0xff] }
 0x684   :  { %v3154_v28 = vadd.f32 %v931_v25, %v930_v24  ;;  %v918_v54 = vmul.f32 %v2549_v22, %v917_v1 }
 0x686   :  { %2552 = vtanh.f32 %v3154_v28  ;;  %v919_v60 = vadd.f32 %v2549_v22, %v918_v54 }
 0x688   :  { %v923_v53 = vsel %vm922_vm0, %v2549_v22, %v919_v60  ;;  %v3247_v22 = vld [vmem:[#allocation5 + $0x60] sm:$0xff] }
 0x689   :  { %v928_v56 = vsel %vm925_vm1, %v927_v17, %v923_v53  ;;  %3610 = vst [vmem:[#allocation12_spill] sm:$0xff] %v3247_v22 }
 0x68c   :  { %v2553_v45 = vpop.eup %2552 }
 0x68d   :  { %v934_v5 = vmul.f32 %v2553_v45, %v928_v56 }
 0x68f   :  { %2434 = vmatmul.msk.f32.vlgmr.msra.gmra.mxu0 %vm148_vm2, %v934_v5  ;;  %2436 = vmatmul.msk.f32.vlgmr.msrb.gmra.mxu1 %vm148_vm2, %v934_v5 }
 0x690   :  { %2439 = vmatmul.msk.f32.vlgmr.msrb.gmra.mxu3 %vm148_vm2, %v934_v5  ;;  %1178 = vmatpush.msra.mxu0 %v2929_v41 }
 0x691   :  { %1226 = vmatpush.msrb.mxu1 %v2986_v58  ;;  %1292 = vmatpush.msrb.mxu3 %v3162_v46 }
 0x692   :  { %1179 = vmatpush.msra.mxu0 %v2935_v42 }
 0x693   :  { %1227 = vmatpush.msrb.mxu1 %v2991_v59  ;;  %1293 = vmatpush.msrb.mxu3 %v3167_v10 }
 0x694   :  { %1180 = vmatpush.msra.mxu0 %v2939_v43 }
 0x695   :  { %1228 = vmatpush.msrb.mxu1 %v2997_v61  ;;  %1294 = vmatpush.msrb.mxu3 %v3172_v52 }
 0x696   :  { %1181 = vmatpush.msra.mxu0 %v2946_v44 }
 0x697   :  { %2442 = vmatmul.msk.f32.vlgmr.msra.gmra.mxu1 %vm148_vm2, %v934_v5  ;;  %1295 = vmatpush.msrb.mxu3 %v2846_v14 }
 0x698   :  { %2444 = vmatmul.msk.f32.vlgmr.msra.gmra.mxu3 %vm148_vm2, %v934_v5  ;;  %1229 = vmatpush.msrb.mxu1 %v3008_v2 }
 0x699   :  { %1412 = vmatpush.msra.mxu3 %v2901_v31 }
 0x69a   :  { %1352 = vmatpush.msra.mxu1 %v2898_v30 }
 0x69b   :  { %1413 = vmatpush.msra.mxu3 %v2905_v33 }
 0x69c   :  { %1353 = vmatpush.msra.mxu1 %v2903_v32 }
 0x69d   :  { %1414 = vmatpush.msra.mxu3 %v2912_v35 }
 0x69e   :  { %1354 = vmatpush.msra.mxu1 %v2909_v34 }
 0x69f   :  { %1415 = vmatpush.msra.mxu3 %v2919_v37 }
 0x6a0   :  { %1355 = vmatpush.msra.mxu1 %v2916_v36 }
 0x70c   :  { %v955_v14 = vpop.f32.mrf.mxu0  ;;  %v998_v27 = vpop.f32.mrf.mxu1 }
 0x70d   :  { %v3189_v41 = vadd.f32 %v955_v14, %v3054_v16 }
 0x70f   :  { %3609 = vst [vmem:[#allocation11_spill] sm:$0xff] %v3189_v41  ;;  %v958_v30 = vsel %vm405_vm15, %v3189_v41, -inf }
 0x710   :  { %959 = vmax.xlane.f32.xlu0 %v958_v30 }
 0x713   :  { %v1061_v18 = vpop.f32.mrf.mxu3 }
 0x71b   :  { %v1163_v1 = vpop.f32.mrf.mxu3 }
 0x783   :  { %v960_v31 = vpop.xlane.xlu0 %959 }
 0x784   :  { %vm961_vm3 = vcmp.eq.f32.partialorder %v3189_v41, %v960_v31 }
 0x785   :  { %v962_v32 = vsel %vm961_vm3, %v2816_v3, 32 }
 0x786   :  { %v963_v33 = vsel %vm405_vm15, %v962_v32, 2147483647 }
 0x787   :  { %v965_v34 = vshra.s32 %v963_v33, 16  ;;  %v964_v36 = vand.u32 65535, %v963_v33  ;;  %v1121_v33 = vpop.f32.mrf.mxu1 }
 0x789   :  { %v967_v35 = vcvt.s32.f32 %v965_v34  ;;  %v966_v42 = vcvt.s32.f32 %v964_v36 }
 0x78b   :  { %968 = vmin.xlane.f32.xlu1 %v967_v35 }
 0x7fe   :  { %v969_v37 = vpop.xlane.xlu1 %968 }
 0x7ff   :  { %vm970_vm4 = vcmp.eq.f32.partialorder %v967_v35, %v969_v37  ;;  %v975_v44 = vcvt.f32.s32 %v969_v37 }
 0x800   :  { %v971_v43 = vsel %vm970_vm4, %v966_v42, inf }
 0x801   :  { %972 = vmin.xlane.f32.xlu2 %v971_v43  ;;  %v976_v59 = vshll.u32 %v975_v44, 16 }
 0x874   :  { %v973_v58 = vpop.xlane.xlu2 %972 }
 0x875   :  { %v974_v61 = vcvt.f32.s32 %v973_v58 }
 0x877   :  { %v977_v2 = vadd.s32 %v976_v59, %v974_v61 }
 0x879   :  { %vm978_vm5 = vcmp.eq.s32.totalorder %v2816_v3, %v977_v2 }
 0x87a   :  { %v2435_v63 = vsel %vm978_vm5, 1.0, %v3602_v0 }
 0x87b   :  { %2437 = vmatmul.msk.f32.vlgmr.msrb.gmra.mxu2 %vm148_vm2, %v2435_v63  ;;  %2440 = vmatmul.msk.f32.vlgmr.msrb.gmra.mxu0 %vm148_vm2, %v2435_v63 }
 0x87c   :  { %1269 = vmatpush.msrb.mxu2 %v3200_v62  ;;  %1332 = vmatpush.msrb.mxu0 %v3203_v49 }
 0x87e   :  { %1270 = vmatpush.msrb.mxu2 %v3206_v4  ;;  %1333 = vmatpush.msrb.mxu0 %v3209_v9 }
 0x880   :  { %1271 = vmatpush.msrb.mxu2 %v3212_v48  ;;  %1334 = vmatpush.msrb.mxu0 %v3215_v13 }
 0x882   :  { %1272 = vmatpush.msrb.mxu2 %v3218_v38  ;;  %1335 = vmatpush.msrb.mxu0 %v3221_v39 }
 0x883   :  { %2443 = vmatmul.msk.f32.vlgmr.msra.gmra.mxu2 %vm148_vm2, %v2435_v63  ;;  %2445 = vmatmul.msk.f32.vlgmr.msra.gmra.mxu0 %vm148_vm2, %v2435_v63 }
 0x884   :  { %1392 = vmatpush.msra.mxu2 %v3226_v50  ;;  %1434 = vmatpush.msra.mxu0 %v3229_v55 }
 0x886   :  { %1393 = vmatpush.msra.mxu2 %v3232_v47  ;;  %1435 = vmatpush.msra.mxu0 %v3235_v15 }
 0x888   :  { %1394 = vmatpush.msra.mxu2 %v3238_v7  ;;  %1436 = vmatpush.msra.mxu0 %v3241_v8 }
 0x88a   :  { %1395 = vmatpush.msra.mxu2 %v3244_v11  ;;  %1437 = vmatpush.msra.mxu0 %v3247_v22 }
 0x8f8   :  { %v1081_v23 = vpop.f32.mrf.mxu0 }
 0x8f9   :  { %v1082_v19 = vadd.f32 %v1081_v23, %v1061_v18 }
 0x8fb   :  { %v1084_v20 = vadd.f32 %v3606_v26, %v1082_v19 }
 0x8fd   :  { %v2441_v21 = vmul.f32 -1.442695, %v1084_v20 }
 0x8fe   :  { %v1021_v24 = vpop.f32.mrf.mxu2 }
 0x8ff   :  { %2554 = vpow2.f32 %v2441_v21  ;;  %v1022_v25 = vadd.f32 %v1021_v24, %v998_v27 }
 0x900   :  { %v1183_v54 = vpop.f32.mrf.mxu0 }
 0x901   :  { %v1024_v57 = vadd.f32 %v1022_v25, %v3605_v12  ;;  %v1184_v60 = vadd.f32 %v1183_v54, %v1163_v1 }
 0x903   :  { %v2438_v40 = vmul.f32 -1.442695, %v1024_v57  ;;  %v1186_v53 = vadd.f32 %v3607_v29, %v1184_v60 }
 0x905   :  { %v2555_v17 = vpop.eup %2554  ;;  %2556 = vpow2.f32 %v2438_v40  ;;  %v2446_v45 = vmul.f32 -1.442695, %v1186_v53 }
 0x906   :  { %v1088_v56 = vadd.f32 1.0, %v2555_v17  ;;  %v1141_v30 = vpop.f32.mrf.mxu2 }
 0x907   :  { %2558 = vpow2.f32 %v2446_v45  ;;  %v1142_v12 = vadd.f32 %v1141_v30, %v1121_v33  ;;  %v3271_v33 = vld [vmem:[#allocation2 + $0x70] sm:$0xff] }
 0x908   :  { %2560 = vrcp.f32 %v1088_v56  ;;  %v1100_v58 = vand.u32 2147483648, %v1088_v56  ;;  %vm1094_vm7 = vweird.f32 %v1088_v56  ;;  %v1098_v2 = vand.u32 2147483647, %v1088_v56 }
 0x909   :  { %v1144_v37 = vadd.f32 %v3608_v51, %v1142_v12  ;;  %v3281_v12 = vld [vmem:[#allocation2 + $0x68] sm:$0xff] }
 0x90a   :  { %v1101_v20 = vor.u32 1.1754944e-38, %v1100_v58  ;;  %vm1099_vm11 = vcmp.eq.f32.partialorder %v1098_v2, 8.507059e+37  ;;  %v3314_v58 = vld [vmem:[#allocation2 + $0x50] sm:$0xff]  ;;  %v3323_v2 = vld [vmem:[#allocation2 + $0x20] sm:$0xff] }
 0x90b   :  { %v2557_v26 = vpop.eup %2556 }
 0x90c   :  { %v1028_v5 = vadd.f32 1.0, %v2557_v26 }
 0x90d   :  { %v2559_v14 = vpop.eup %2558 }
 0x90e   :  { %v2561_v31 = vpop.eup %2560  ;;  %2562 = vrcp.f32 %v1028_v5  ;;  %v1190_v32 = vadd.f32 1.0, %v2559_v14  ;;  %v1040_v63 = vand.u32 2147483648, %v1028_v5  ;;  %v1038_v23 = vand.u32 2147483647, %v1028_v5 }
 0x90f   :  { %v1090_v34 = vmul.f32 %v2561_v31, %v1088_v56  ;;  %vm1095_vm6 = vweird.f32 %v2561_v31  ;;  %vm1034_vm10 = vweird.f32 %v1028_v5 }
 0x910   :  { %2564 = vrcp.f32 %v1190_v32  ;;  %vm1096_vm8 = vmor %vm1094_vm7, %vm1095_vm6  ;;  %v1041_v51 = vor.u32 1.1754944e-38, %v1040_v63  ;;  %vm1039_vm13 = vcmp.eq.f32.partialorder %v1038_v23, 8.507059e+37  ;;  %v1202_v45 = vand.u32 2147483648, %v1190_v32  ;;  %v3326_v63 = vld [vmem:[#allocation2 + $0x40] sm:$0xff] }
 0x911   :  { %v1091_v35 = vsub.f32 1.0, %v1090_v34  ;;  %2566 = vtanh.f32 %v1144_v37  ;;  %vm1196_vm0 = vweird.f32 %v1190_v32  ;;  %v1200_v56 = vand.u32 2147483647, %v1190_v32  ;;  %v3277_v34 = vld [vmem:[%s3569_s6 + $0x10] sm:$0xff]  ;;  %v3302_v37 = vld [vmem:[%s3569_s6] sm:$0xff] }
 0x913   :  { %v1092_v36 = vmul.f32 %v2561_v31, %v1091_v35  ;;  %vm1201_vm3 = vcmp.eq.f32.partialorder %v1200_v56, 8.507059e+37  ;;  %v3287_v35 = vld [vmem:[%s3569_s6 + $0x8] sm:$0xff] }
 0x914   :  { %v2563_v29 = vpop.eup %2562 }
 0x915   :  { %v1030_v42 = vmul.f32 %v2563_v29, %v1028_v5  ;;  %v1093_v43 = vadd.f32 %v2561_v31, %v1092_v36  ;;  %vm1035_vm9 = vweird.f32 %v2563_v29  ;;  %v1203_v5 = vor.u32 1.1754944e-38, %v1202_v45  ;;  %v3291_v36 = vld [vmem:[#allocation2 + $0x60] sm:$0xff] }
 0x916   :  { %v2565_v44 = vpop.eup %2564  ;;  %vm1036_vm12 = vmor %vm1034_vm10, %vm1035_vm9 }
 0x917   :  { %v1031_v59 = vsub.f32 1.0, %v1030_v42  ;;  %v1192_v61 = vmul.f32 %v2565_v44, %v1190_v32  ;;  %v1097_v19 = vsel %vm1096_vm8, %v2561_v31, %v1093_v43  ;;  %v2567_v1 = vpop.eup %2566  ;;  %vm1197_vm14 = vweird.f32 %v2565_v44  ;;  %v3267_v32 = vld [vmem:[%s3569_s6 + $0x18] sm:$0xff] }
 0x918   :  { %v1102_v24 = vsel %vm1099_vm11, %v1101_v20, %v1097_v19  ;;  %vm1198_vm1 = vmor %vm1196_vm0, %vm1197_vm14  ;;  %v3305_v42 = vld [vmem:[#allocation2 + $0x38] sm:$0xff] }
 0x919   :  { %v1032_v18 = vmul.f32 %v2563_v29, %v1031_v59  ;;  %v1193_v21 = vsub.f32 1.0, %v1192_v61  ;;  %v1206_v60 = vmul.f32 %v1102_v24, %v3154_v28  ;;  %v3261_v28 = vld [vmem:[#allocation2 + $0x78] sm:$0xff]  ;;  %v3317_v59 = vld [vmem:[#allocation2 + $0x28] sm:$0xff] }
 0x91a   :  { %v3308_v43 = vld [vmem:[#allocation2 + $0x58] sm:$0xff]  ;;  %v3320_v61 = vld [vmem:[#allocation2 + $0x48] sm:$0xff] }
 0x91b   :  { %v1033_v27 = vadd.f32 %v2563_v29, %v1032_v18  ;;  %v1194_v54 = vmul.f32 %v2565_v44, %v1193_v21 }
 0x91d   :  { %v1037_v25 = vsel %vm1036_vm12, %v2563_v29, %v1033_v27  ;;  %v1195_v17 = vadd.f32 %v2565_v44, %v1194_v54  ;;  %v3295_v29 = vld [vmem:[#allocation2] sm:$0xff] }
 0x91e   :  { %v1042_v57 = vsel %vm1039_vm13, %v1041_v51, %v1037_v25 }
 0x91f   :  { %v1207_v40 = vmul.f32 %v2567_v1, %v1042_v57  ;;  %v1199_v26 = vsel %vm1198_vm1, %v2565_v44, %v1195_v17  ;;  %v3311_v44 = vld [vmem:[#allocation2 + $0x30] sm:$0xff] }
 0x920   :  { %v1204_v30 = vsel %vm1201_vm3, %v1203_v5, %v1199_v26 }
 0x921   :  { %v3255_v53 = vadd.f32 %v1207_v40, %v1206_v60 }
 0x923   :  { %2568 = vtanh.f32 %v3255_v53 }
 0x929   :  { %v2569_v14 = vpop.eup %2568 }
 0x92a   :  { %v1210_v31 = vmul.f32 %v2569_v14, %v1204_v30  ;;  %v3362_v30 = vld [vmem:[%s3568_s5 + $0x1] sm:$0x1] }
 0x92b   :  { %3612 = vst [vmem:[#allocation14_spill] sm:$0xff] %v3362_v30 }
 0x92c   :  { %2447 = vmatmul.msk.f32.vlgmr.msrb.gmra.mxu1 %vm148_vm2, %v1210_v31  ;;  %2449 = vmatmul.msk.f32.vlgmr.msrb.gmra.mxu2 %vm148_vm2, %v1210_v31 }
 0x92d   :  { %2452 = vmatmul.msk.f32.vlgmr.msrb.gmra.mxu0 %vm148_vm2, %v1210_v31  ;;  %1454 = vmatpush.msrb.mxu1 %v3261_v28 }
 0x92e   :  { %1502 = vmatpush.msrb.mxu2 %v3267_v32  ;;  %1568 = vmatpush.msrb.mxu0 %v3162_v46 }
 0x92f   :  { %1455 = vmatpush.msrb.mxu1 %v3271_v33 }
 0x930   :  { %1503 = vmatpush.msrb.mxu2 %v3277_v34  ;;  %1569 = vmatpush.msrb.mxu0 %v3167_v10 }
 0x931   :  { %1456 = vmatpush.msrb.mxu1 %v3281_v12 }
 0x932   :  { %1504 = vmatpush.msrb.mxu2 %v3287_v35  ;;  %1570 = vmatpush.msrb.mxu0 %v3172_v52 }
 0x933   :  { %1457 = vmatpush.msrb.mxu1 %v3291_v36 }
 0x934   :  { %2455 = vmatmul.msk.f32.vlgmr.msra.gmra.mxu2 %vm148_vm2, %v1210_v31  ;;  %1571 = vmatpush.msrb.mxu0 %v3295_v29 }
 0x935   :  { %2457 = vmatmul.msk.f32.vlgmr.msra.gmra.mxu0 %vm148_vm2, %v1210_v31  ;;  %1505 = vmatpush.msrb.mxu2 %v3302_v37 }
 0x936   :  { %1688 = vmatpush.msra.mxu0 %v3308_v43 }
 0x937   :  { %1628 = vmatpush.msra.mxu2 %v3305_v42 }
 0x938   :  { %1689 = vmatpush.msra.mxu0 %v3314_v58 }
 0x939   :  { %1629 = vmatpush.msra.mxu2 %v3311_v44 }
 0x93a   :  { %1690 = vmatpush.msra.mxu0 %v3320_v61 }
 0x93b   :  { %1630 = vmatpush.msra.mxu2 %v3317_v59 }
 0x93c   :  { %1691 = vmatpush.msra.mxu0 %v3326_v63 }
 0x93d   :  { %1631 = vmatpush.msra.mxu2 %v3323_v2 }
 0x9a9   :  { %v1231_v18 = vpop.f32.mrf.mxu1 }
 0x9aa   :  { %v3330_v23 = vadd.f32 %v1231_v18, %v3054_v16  ;;  %v1337_v26 = vpop.f32.mrf.mxu0 }
 0x9ac   :  { %3611 = vst [vmem:[#allocation13_spill] sm:$0xff] %v3330_v23  ;;  %v1234_v19 = vsel %vm405_vm15, %v3330_v23, -inf }
 0x9ad   :  { %1235 = vmax.xlane.f32.xlu0 %v1234_v19 }
 0x9af   :  { %v1274_v19 = vpop.f32.mrf.mxu2 }
 0xa20   :  { %v1236_v20 = vpop.xlane.xlu0 %1235 }
 0xa21   :  { %vm1237_vm4 = vcmp.eq.f32.partialorder %v3330_v23, %v1236_v20 }
 0xa22   :  { %v1238_v21 = vsel %vm1237_vm4, %v2816_v3, 32 }
 0xa23   :  { %v1239_v27 = vsel %vm405_vm15, %v1238_v21, 2147483647 }
 0xa24   :  { %v1241_v51 = vshra.s32 %v1239_v27, 16  ;;  %v1240_v25 = vand.u32 65535, %v1239_v27  ;;  %v1439_v27 = vpop.f32.mrf.mxu0 }
 0xa26   :  { %v1243_v24 = vcvt.s32.f32 %v1241_v51  ;;  %v1242_v54 = vcvt.s32.f32 %v1240_v25 }
 0xa28   :  { %1244 = vmin.xlane.f32.xlu1 %v1243_v24 }
 0xa9b   :  { %v1245_v1 = vpop.xlane.xlu1 %1244 }
 0xa9c   :  { %vm1246_vm5 = vcmp.eq.f32.partialorder %v1243_v24, %v1245_v1  ;;  %v1251_v57 = vcvt.f32.s32 %v1245_v1  ;;  %v3368_v24 = vld [vmem:[%s3568_s5] sm:$0x1] }
 0xa9d   :  { %v1247_v16 = vsel %vm1246_vm5, %v1242_v54, inf  ;;  %3613 = vst [vmem:[#allocation17_spill] sm:$0xff] %v3368_v24 }
 0xa9e   :  { %1248 = vmin.xlane.f32.xlu2 %v1247_v16  ;;  %v1252_v40 = vshll.u32 %v1251_v57, 16  ;;  %v3374_v16 = vld [vmem:[%s3568_s5 + $0x3] sm:$0x1] }
 0xa9f   :  { %3614 = vst [vmem:[#allocation18_spill] sm:$0xff] %v3374_v16 }
 0xb11   :  { %v1249_v60 = vpop.xlane.xlu2 %1248 }
 0xb12   :  { %v1250_v17 = vcvt.f32.s32 %v1249_v60 }
 0xb14   :  { %v1253_v45 = vadd.s32 %v1252_v40, %v1250_v17 }
 0xb16   :  { %vm1254_vm6 = vcmp.eq.s32.totalorder %v2816_v3, %v1253_v45 }
 0xb17   :  { %v2448_v56 = vsel %vm1254_vm6, 1.0, %v3602_v0 }
 0xb18   :  { %2450 = vmatmul.msk.f32.vlgmr.msrb.gmra.mxu3 %vm148_vm2, %v2448_v56  ;;  %2453 = vmatmul.msk.f32.vlgmr.msra.gmra.mxu1 %vm148_vm2, %v2448_v56 }
 0xb19   :  { %1545 = vmatpush.msrb.mxu3 %v3200_v62  ;;  %1608 = vmatpush.msra.mxu1 %v3203_v49 }
 0xb1b   :  { %1546 = vmatpush.msrb.mxu3 %v3206_v4  ;;  %1609 = vmatpush.msra.mxu1 %v3209_v9 }
 0xb1d   :  { %1547 = vmatpush.msrb.mxu3 %v3212_v48  ;;  %1610 = vmatpush.msra.mxu1 %v3215_v13 }
 0xb1f   :  { %1548 = vmatpush.msrb.mxu3 %v3218_v38  ;;  %1611 = vmatpush.msra.mxu1 %v3221_v39 }
 0xb20   :  { %2456 = vmatmul.msk.f32.vlgmr.msra.gmra.mxu3 %vm148_vm2, %v2448_v56  ;;  %2458 = vmatmul.msk.f32.vlgmr.msrb.gmra.mxu1 %vm148_vm2, %v2448_v56 }
 0xb21   :  { %1668 = vmatpush.msra.mxu3 %v3226_v50  ;;  %1710 = vmatpush.msrb.mxu1 %v3229_v55 }
 0xb23   :  { %1669 = vmatpush.msra.mxu3 %v3232_v47  ;;  %1711 = vmatpush.msrb.mxu1 %v3235_v15 }
 0xb25   :  { %1670 = vmatpush.msra.mxu3 %v3238_v7  ;;  %1712 = vmatpush.msrb.mxu1 %v3241_v8 }
 0xb27   :  { %1671 = vmatpush.msra.mxu3 %v3244_v11  ;;  %1713 = vmatpush.msrb.mxu1 %v3247_v22 }
 0xb95   :  { %v1357_v5 = vpop.f32.mrf.mxu1 }
 0xb96   :  { %v1358_v14 = vadd.f32 %v1357_v5, %v1337_v26 }
 0xb98   :  { %v1360_v31 = vadd.f32 %v3362_v30, %v1358_v14 }
 0xb9a   :  { %v2454_v18 = vmul.f32 -1.442695, %v1360_v31 }
 0xb9b   :  { %v1297_v20 = vpop.f32.mrf.mxu3 }
 0xb9c   :  { %2570 = vpow2.f32 %v2454_v18  ;;  %v1298_v21 = vadd.f32 %v1297_v20, %v1274_v19  ;;  %v1397_v18 = vpop.f32.mrf.mxu2 }
 0xb9d   :  { %v1459_v51 = vpop.f32.mrf.mxu1 }
 0xb9e   :  { %v1300_v25 = vadd.f32 %v3368_v24, %v1298_v21  ;;  %v1460_v1 = vadd.f32 %v1459_v51, %v1439_v27 }
 0xba0   :  { %v2451_v54 = vmul.f32 -1.442695, %v1300_v25  ;;  %v1462_v57 = vadd.f32 %v3374_v16, %v1460_v1  ;;  %v3380_v25 = vld [vmem:[%s3568_s5 + $0x2] sm:$0x1] }
 0xba1   :  { %3615 = vst [vmem:[#allocation19_spill] sm:$0xff] %v3380_v25 }
 0xba2   :  { %v2571_v60 = vpop.eup %2570  ;;  %2572 = vpow2.f32 %v2451_v54  ;;  %v2459_v40 = vmul.f32 -1.442695, %v1462_v57 }
 0xba3   :  { %v1364_v17 = vadd.f32 1.0, %v2571_v60  ;;  %v1417_v5 = vpop.f32.mrf.mxu3 }
 0xba4   :  { %2574 = vpow2.f32 %v2459_v40  ;;  %v1418_v20 = vadd.f32 %v1417_v5, %v1397_v18 }
 0xba5   :  { %2576 = vrcp.f32 %v1364_v17  ;;  %v1376_v40 = vand.u32 2147483648, %v1364_v17  ;;  %vm1370_vm8 = vweird.f32 %v1364_v17  ;;  %v1374_v23 = vand.u32 2147483647, %v1364_v17 }
 0xba6   :  { %v1420_v1 = vadd.f32 %v3380_v25, %v1418_v20 }
 0xba7   :  { %v1377_v41 = vor.u32 1.1754944e-38, %v1376_v40  ;;  %vm1375_vm12 = vcmp.eq.f32.partialorder %v1374_v23, 8.507059e+37 }
 0xba8   :  { %v2573_v45 = vpop.eup %2572 }
 0xba9   :  { %v1304_v56 = vadd.f32 1.0, %v2573_v45 }
 0xbaa   :  { %v2575_v26 = vpop.eup %2574 }
 0xbab   :  { %v2577_v14 = vpop.eup %2576  ;;  %2578 = vrcp.f32 %v1304_v56  ;;  %v1466_v31 = vadd.f32 1.0, %v2575_v26  ;;  %v1316_v5 = vand.u32 2147483648, %v1304_v56  ;;  %vm1310_vm11 = vweird.f32 %v1304_v56 }
 0xbac   :  { %v1366_v19 = vmul.f32 %v2577_v14, %v1364_v17  ;;  %vm1371_vm7 = vweird.f32 %v2577_v14 }
 0xbad   :  { %2580 = vrcp.f32 %v1466_v31  ;;  %vm1372_vm9 = vmor %vm1370_vm8, %vm1371_vm7  ;;  %v1317_v20 = vor.u32 1.1754944e-38, %v1316_v5  ;;  %vm1472_vm1 = vweird.f32 %v1466_v31  ;;  %v1476_v23 = vand.u32 2147483647, %v1466_v31 }
 0xbae   :  { %v1367_v21 = vsub.f32 1.0, %v1366_v19  ;;  %2582 = vtanh.f32 %v1420_v1  ;;  %v1314_v19 = vand.u32 2147483647, %v1304_v56 }
 0xbaf   :  { %vm1477_vm4 = vcmp.eq.f32.partialorder %v1476_v23, 8.507059e+37 }
 0xbb0   :  { %v1368_v27 = vmul.f32 %v2577_v14, %v1367_v21  ;;  %vm1315_vm14 = vcmp.eq.f32.partialorder %v1314_v19, 8.507059e+37 }
 0xbb1   :  { %v2579_v51 = vpop.eup %2578 }
 0xbb2   :  { %v1306_v54 = vmul.f32 %v2579_v51, %v1304_v56  ;;  %v1369_v57 = vadd.f32 %v2577_v14, %v1368_v27  ;;  %vm1311_vm10 = vweird.f32 %v2579_v51 }
 0xbb3   :  { %v2581_v60 = vpop.eup %2580  ;;  %vm1312_vm13 = vmor %vm1310_vm11, %vm1311_vm10 }
 0xbb4   :  { %v1307_v45 = vsub.f32 1.0, %v1306_v54  ;;  %v1468_v26 = vmul.f32 %v2581_v60, %v1466_v31  ;;  %v1373_v21 = vsel %vm1372_vm9, %v2577_v14, %v1369_v57  ;;  %v2583_v54 = vpop.eup %2582  ;;  %vm1473_vm0 = vweird.f32 %v2581_v60 }
 0xbb5   :  { %v1378_v27 = vsel %vm1375_vm12, %v1377_v41, %v1373_v21  ;;  %v1478_v14 = vand.u32 2147483648, %v1466_v31  ;;  %vm1474_vm3 = vmor %vm1472_vm1, %vm1473_vm0 }
 0xbb6   :  { %v1308_v18 = vmul.f32 %v2579_v51, %v1307_v45  ;;  %v1469_v6 = vsub.f32 1.0, %v1468_v26  ;;  %v1482_v24 = vmul.f32 %v1378_v27, %v3255_v53  ;;  %v3415_v53 = vld [vmem:[%s3570_s7] sm:$0x1]  ;;  %s2758_s7 = smov [#allocation7]  }
 0xbb7   :  { %v1479_v41 = vor.u32 1.1754944e-38, %v1478_v14  ;;  %v3617_v14 = vld [vmem:[#allocation12_spill] sm:$0xff]  ;;  %s2379_s11 = sshll.u32 %s2758_s7, 4  ;;  %s2380_s11 = int_to_ptr.vmem [resolvable:$true] %s2379_s11 }
 0xbb8   :  { %v1309_v16 = vadd.f32 %v2579_v51, %v1308_v18  ;;  %v1470_v30 = vmul.f32 %v2581_v60, %v1469_v6 }
 0xbba   :  { %v1313_v25 = vsel %vm1312_vm13, %v2579_v51, %v1309_v16  ;;  %v1471_v22 = vadd.f32 %v2581_v60, %v1470_v30 }
 0xbbb   :  { %v1318_v17 = vsel %vm1315_vm14, %v1317_v20, %v1313_v25 }
 0xbbc   :  { %v1483_v1 = vmul.f32 %v2583_v54, %v1318_v17  ;;  %v1475_v56 = vsel %vm1474_vm3, %v2581_v60, %v1471_v22 }
 0xbbd   :  { %v1480_v51 = vsel %vm1477_vm4, %v1479_v41, %v1475_v56 }
 0xbbe   :  { %v3384_v45 = vadd.f32 %v1483_v1, %v1482_v24 }
 0xbc0   :  { %2584 = vtanh.f32 %v3384_v45 }
 0xbc6   :  { %v2585_v16 = vpop.eup %2584 }
 0xbc7   :  { %v1486_v6 = vmul.f32 %v2585_v16, %v1480_v51  ;;  %v3618_v16 = vld [vmem:[#allocation17_spill] sm:$0xff] }
 0xbc9   :  { %2460 = vmatmul.msk.f32.vlgmr.msrb.gmra.mxu2 %vm148_vm2, %v1486_v6  ;;  %2462 = vmatmul.msk.f32.vlgmr.msrb.gmra.mxu3 %vm148_vm2, %v1486_v6 }
 0xbca   :  { %2465 = vmatmul.msk.f32.vlgmr.msra.gmra.mxu1 %vm148_vm2, %v1486_v6  ;;  %1730 = vmatpush.msrb.mxu2 %v3261_v28 }
 0xbcb   :  { %1778 = vmatpush.msrb.mxu3 %v3267_v32  ;;  %1844 = vmatpush.msra.mxu1 %v3162_v46 }
 0xbcc   :  { %1731 = vmatpush.msrb.mxu2 %v3271_v33 }
 0xbcd   :  { %1779 = vmatpush.msrb.mxu3 %v3277_v34  ;;  %1845 = vmatpush.msra.mxu1 %v3167_v10 }
 0xbce   :  { %1732 = vmatpush.msrb.mxu2 %v3281_v12 }
 0xbcf   :  { %1780 = vmatpush.msrb.mxu3 %v3287_v35  ;;  %1846 = vmatpush.msra.mxu1 %v3172_v52 }
 0xbd0   :  { %1733 = vmatpush.msrb.mxu2 %v3291_v36 }
 0xbd1   :  { %2468 = vmatmul.msk.f32.vlgmr.msra.gmra.mxu3 %vm148_vm2, %v1486_v6  ;;  %1847 = vmatpush.msra.mxu1 %v3295_v29 }
 0xbd2   :  { %2470 = vmatmul.msk.f32.vlgmr.msrb.gmra.mxu1 %vm148_vm2, %v1486_v6  ;;  %1781 = vmatpush.msrb.mxu3 %v3302_v37 }
 0xbd3   :  { %1964 = vmatpush.msrb.mxu1 %v3308_v43 }
 0xbd4   :  { %1904 = vmatpush.msra.mxu3 %v3305_v42 }
 0xbd5   :  { %1965 = vmatpush.msrb.mxu1 %v3314_v58 }
 0xbd6   :  { %1905 = vmatpush.msra.mxu3 %v3311_v44 }
 0xbd7   :  { %1966 = vmatpush.msrb.mxu1 %v3320_v61 }
 0xbd8   :  { %1906 = vmatpush.msra.mxu3 %v3317_v59 }
 0xbd9   :  { %1967 = vmatpush.msrb.mxu1 %v3326_v63 }
 0xbda   :  { %1907 = vmatpush.msra.mxu3 %v3323_v2 }
 0xc47   :  { %v1613_v6 = vpop.f32.mrf.mxu1 }
 0xc4c   :  { %v1507_v22 = vpop.f32.mrf.mxu2  ;;  %v1550_v23 = vpop.f32.mrf.mxu3 }
 0xc4d   :  { %v3418_v30 = vadd.f32 %v3415_v53, %v1507_v22 }
 0xc4f   :  { %3616 = vst [vmem:[#allocation20_spill] sm:$0xff] %v3418_v30  ;;  %v1510_v24 = vsel %vm405_vm15, %v3418_v30, -inf }
 0xc50   :  { %1511 = vmax.xlane.f32.xlu0 %v1510_v24 }
 0xcc3   :  { %v1512_v31 = vpop.xlane.xlu0 %1511 }
 0xcc4   :  { %vm1513_vm5 = vcmp.eq.f32.partialorder %v3418_v30, %v1512_v31 }
 0xcc5   :  { %v1514_v25 = vsel %vm1513_vm5, %v2816_v3, 32 }
 0xcc6   :  { %v1515_v57 = vsel %vm405_vm15, %v1514_v25, 2147483647  ;;  %v3619_v25 = vld [vmem:[#allocation14_spill] sm:$0xff] }
 0xcc7   :  { %v1517_v60 = vshra.s32 %v1515_v57, 16  ;;  %v1516_v26 = vand.u32 65535, %v1515_v57 }
 0xcc9   :  { %v1519_v40 = vcvt.s32.f32 %v1517_v60  ;;  %v1518_v18 = vcvt.s32.f32 %v1516_v26  ;;  %v1715_v26 = vpop.f32.mrf.mxu1 }
 0xccb   :  { %1520 = vmin.xlane.f32.xlu1 %v1519_v40 }
 0xd3e   :  { %v1521_v5 = vpop.xlane.xlu1 %1520 }
 0xd3f   :  { %vm1522_vm6 = vcmp.eq.f32.partialorder %v1519_v40, %v1521_v5  ;;  %v1527_v21 = vcvt.f32.s32 %v1521_v5 }
 0xd40   :  { %v1523_v19 = vsel %vm1522_vm6, %v1518_v18, inf }
 0xd41   :  { %1524 = vmin.xlane.f32.xlu2 %v1523_v19  ;;  %v1528_v27 = vshll.u32 %v1527_v21, 16  ;;  %v3620_v21 = vld [vmem:[#allocation18_spill] sm:$0xff] }
 0xdb4   :  { %v1525_v20 = vpop.xlane.xlu2 %1524 }
 0xdb5   :  { %v1526_v54 = vcvt.f32.s32 %v1525_v20 }
 0xdb7   :  { %v1529_v17 = vadd.s32 %v1528_v27, %v1526_v54 }
 0xdb9   :  { %vm1530_vm7 = vcmp.eq.s32.totalorder %v2816_v3, %v1529_v17 }
 0xdba   :  { %v2461_v1 = vsel %vm1530_vm7, 1.0, %v3602_v0 }
 0xdbb   :  { %2463 = vmatmul.msk.f32.vlgmr.msrb.gmra.mxu0 %vm148_vm2, %v2461_v1  ;;  %2466 = vmatmul.msk.f32.vlgmr.msra.gmra.mxu2 %vm148_vm2, %v2461_v1 }
 0xdbc   :  { %1821 = vmatpush.msrb.mxu0 %v3200_v62  ;;  %1884 = vmatpush.msra.mxu2 %v3203_v49 }
 0xdbe   :  { %1822 = vmatpush.msrb.mxu0 %v3206_v4  ;;  %1885 = vmatpush.msra.mxu2 %v3209_v9 }
 0xdc0   :  { %1823 = vmatpush.msrb.mxu0 %v3212_v48  ;;  %1886 = vmatpush.msra.mxu2 %v3215_v13 }
 0xdc2   :  { %1824 = vmatpush.msrb.mxu0 %v3218_v38  ;;  %1887 = vmatpush.msra.mxu2 %v3221_v39 }
 0xdc3   :  { %2469 = vmatmul.msk.f32.vlgmr.msra.gmra.mxu0 %vm148_vm2, %v2461_v1  ;;  %2471 = vmatmul.msk.f32.vlgmr.msrb.gmra.mxu2 %vm148_vm2, %v2461_v1 }
 0xdc4   :  { %1944 = vmatpush.msra.mxu0 %v3226_v50  ;;  %1986 = vmatpush.msrb.mxu2 %v3229_v55 }
 0xdc6   :  { %1945 = vmatpush.msra.mxu0 %v3232_v47  ;;  %1987 = vmatpush.msrb.mxu2 %v3235_v15 }
 0xdc8   :  { %1946 = vmatpush.msra.mxu0 %v3238_v7  ;;  %1988 = vmatpush.msrb.mxu2 %v3241_v8 }
 0xdca   :  { %1947 = vmatpush.msra.mxu0 %v3244_v11  ;;  %1989 = vmatpush.msrb.mxu2 %v3617_v14 }
 0xe38   :  { %v1573_v56 = vpop.f32.mrf.mxu0 }
 0xe39   :  { %v1574_v41 = vadd.f32 %v1573_v56, %v1550_v23  ;;  %v1673_v56 = vpop.f32.mrf.mxu3 }
 0xe3b   :  { %v1576_v51 = vadd.f32 %v3618_v16, %v1574_v41 }
 0xe3d   :  { %v2464_v22 = vmul.f32 -1.442695, %v1576_v51 }
 0xe3e   :  { %v1633_v24 = vpop.f32.mrf.mxu2 }
 0xe3f   :  { %2586 = vpow2.f32 %v2464_v22  ;;  %v1634_v31 = vadd.f32 %v1633_v24, %v1613_v6 }
 0xe40   :  { %v1693_v1 = vpop.f32.mrf.mxu0 }
 0xe41   :  { %v1636_v57 = vadd.f32 %v3619_v25, %v1634_v31  ;;  %v1694_v51 = vadd.f32 %v1693_v1, %v1673_v56 }
 0xe43   :  { %v2467_v60 = vmul.f32 -1.442695, %v1636_v57  ;;  %v3621_v57 = vld [vmem:[#allocation19_spill] sm:$0xff] }
 0xe45   :  { %v2587_v40 = vpop.eup %2586  ;;  %2588 = vpow2.f32 %v2467_v60  ;;  %v1696_v60 = vadd.f32 %v3621_v57, %v1694_v51 }
 0xe46   :  { %v1580_v5 = vadd.f32 1.0, %v2587_v40  ;;  %v1735_v18 = vpop.f32.mrf.mxu2 }
 0xe47   :  { %v1736_v19 = vadd.f32 %v1735_v18, %v1715_v26 }
 0xe48   :  { %2590 = vrcp.f32 %v1580_v5  ;;  %vm1586_vm9 = vweird.f32 %v1580_v5 }
 0xe49   :  { %v1738_v20 = vadd.f32 %v3620_v21, %v1736_v19  ;;  %v1592_v19 = vand.u32 2147483648, %v1580_v5 }
 0xe4b   :  { %v2589_v27 = vpop.eup %2588  ;;  %v2472_v54 = vmul.f32 -1.442695, %v1738_v20 }
 0xe4c   :  { %v1640_v17 = vadd.f32 1.0, %v2589_v27  ;;  %v1590_v27 = vand.u32 2147483647, %v1580_v5 }
 0xe4d   :  { %2592 = vpow2.f32 %v2472_v54 }
 0xe4e   :  { %v2591_v23 = vpop.eup %2590  ;;  %2594 = vrcp.f32 %v1640_v17  ;;  %v1652_v54 = vand.u32 2147483648, %v1640_v17  ;;  %v1650_v56 = vand.u32 2147483647, %v1640_v17  ;;  %vm1646_vm12 = vweird.f32 %v1640_v17 }
 0xe4f   :  { %v1582_v41 = vmul.f32 %v2591_v23, %v1580_v5  ;;  %vm1587_vm8 = vweird.f32 %v2591_v23  ;;  %vm1591_vm13 = vcmp.eq.f32.partialorder %v1590_v27, 8.507059e+37 }
 0xe50   :  { %vm1588_vm10 = vmor %vm1586_vm9, %vm1587_vm8  ;;  %vm1651_vm0 = vcmp.eq.f32.partialorder %v1650_v56, 8.507059e+37 }
 0xe51   :  { %v1583_v6 = vsub.f32 1.0, %v1582_v41  ;;  %v1593_v41 = vor.u32 1.1754944e-38, %v1592_v19 }
 0xe53   :  { %v2593_v22 = vpop.eup %2592  ;;  %v1584_v24 = vmul.f32 %v2591_v23, %v1583_v6 }
 0xe54   :  { %v2595_v31 = vpop.eup %2594  ;;  %v1742_v40 = vadd.f32 1.0, %v2593_v22  ;;  %v1653_v22 = vor.u32 1.1754944e-38, %v1652_v54 }
 0xe55   :  { %v1642_v26 = vmul.f32 %v2595_v31, %v1640_v17  ;;  %v1585_v18 = vadd.f32 %v2591_v23, %v1584_v24  ;;  %vm1647_vm11 = vweird.f32 %v2595_v31 }
 0xe56   :  { %2596 = vrcp.f32 %v1742_v40  ;;  %vm1648_vm14 = vmor %vm1646_vm12, %vm1647_vm11  ;;  %vm1748_vm3 = vweird.f32 %v1742_v40 }
 0xe57   :  { %v1643_v20 = vsub.f32 1.0, %v1642_v26  ;;  %2598 = vtanh.f32 %v1696_v60  ;;  %v1589_v1 = vsel %vm1588_vm10, %v2591_v23, %v1585_v18  ;;  %v1752_v18 = vand.u32 2147483647, %v1742_v40 }
 0xe58   :  { %v1594_v24 = vsel %vm1591_vm13, %v1593_v41, %v1589_v1 }
 0xe59   :  { %v1644_v30 = vmul.f32 %v2595_v31, %v1643_v20  ;;  %vm1753_vm5 = vcmp.eq.f32.partialorder %v1752_v18, 8.507059e+37 }
 0xe5b   :  { %v1645_v51 = vadd.f32 %v2595_v31, %v1644_v30  ;;  %v1754_v30 = vand.u32 2147483648, %v1742_v40 }
 0xe5c   :  { %v2597_v6 = vpop.eup %2596 }
 0xe5d   :  { %v1649_v57 = vsel %vm1648_vm14, %v2595_v31, %v1645_v51  ;;  %v1744_v26 = vmul.f32 %v2597_v6, %v1742_v40  ;;  %v2599_v21 = vpop.eup %2598  ;;  %vm1749_vm1 = vweird.f32 %v2597_v6  ;;  %v1755_v19 = vor.u32 1.1754944e-38, %v1754_v30 }
 0xe5e   :  { %v1654_v5 = vsel %vm1651_vm0, %v1653_v22, %v1649_v57  ;;  %v1759_v60 = vmul.f32 %v2599_v21, %v1594_v24  ;;  %vm1750_vm4 = vmor %vm1748_vm3, %vm1749_vm1 }
 0xe5f   :  { %v1758_v25 = vmul.f32 %v1654_v5, %v3384_v45  ;;  %v1745_v20 = vsub.f32 1.0, %v1744_v26 }
 0xe61   :  { %v3452_v16 = vadd.f32 %v1759_v60, %v1758_v25  ;;  %v1746_v23 = vmul.f32 %v2597_v6, %v1745_v20 }
 0xe63   :  { %2600 = vtanh.f32 %v3452_v16  ;;  %v1747_v17 = vadd.f32 %v2597_v6, %v1746_v23 }
 0xe65   :  { %v1751_v31 = vsel %vm1750_vm4, %v2597_v6, %v1747_v17 }
 0xe66   :  { %v1756_v57 = vsel %vm1753_vm5, %v1755_v19, %v1751_v31 }
 0xe69   :  { %v2601_v27 = vpop.eup %2600 }
 0xe6a   :  { %v1762_v54 = vmul.f32 %v2601_v27, %v1756_v57  ;;  %v3625_v27 = vld [vmem:[#allocation19_spill] sm:$0xff] }
 0xe6c   :  { %2473 = vmatmul.msk.f32.vlgmr.msrb.gmra.mxu3 %vm148_vm2, %v1762_v54  ;;  %2475 = vmatmul.msk.f32.vlgmr.msrb.gmra.mxu0 %vm148_vm2, %v1762_v54 }
 0xe6d   :  { %2478 = vmatmul.msk.f32.vlgmr.msra.gmra.mxu2 %vm148_vm2, %v1762_v54  ;;  %2006 = vmatpush.msrb.mxu3 %v3261_v28 }
 0xe6e   :  { %2054 = vmatpush.msrb.mxu0 %v3267_v32  ;;  %2120 = vmatpush.msra.mxu2 %v3162_v46 }
 0xe6f   :  { %2007 = vmatpush.msrb.mxu3 %v3271_v33 }
 0xe70   :  { %2055 = vmatpush.msrb.mxu0 %v3277_v34  ;;  %2121 = vmatpush.msra.mxu2 %v3167_v10 }
 0xe71   :  { %2008 = vmatpush.msrb.mxu3 %v3281_v12 }
 0xe72   :  { %2056 = vmatpush.msrb.mxu0 %v3287_v35  ;;  %2122 = vmatpush.msra.mxu2 %v3172_v52 }
 0xe73   :  { %2009 = vmatpush.msrb.mxu3 %v3291_v36 }
 0xe74   :  { %2481 = vmatmul.msk.f32.vlgmr.msra.gmra.mxu0 %vm148_vm2, %v1762_v54  ;;  %2123 = vmatpush.msra.mxu2 %v3295_v29 }
 0xe75   :  { %2483 = vmatmul.msk.f32.vlgmr.msrb.gmra.mxu2 %vm148_vm2, %v1762_v54  ;;  %2057 = vmatpush.msrb.mxu0 %v3302_v37 }
 0xe76   :  { %2240 = vmatpush.msrb.mxu2 %v3308_v43 }
 0xe77   :  { %2180 = vmatpush.msra.mxu0 %v3305_v42 }
 0xe78   :  { %2241 = vmatpush.msrb.mxu2 %v3314_v58 }
 0xe79   :  { %2181 = vmatpush.msra.mxu0 %v3311_v44 }
 0xe7a   :  { %2242 = vmatpush.msrb.mxu2 %v3320_v61 }
 0xe7b   :  { %2182 = vmatpush.msra.mxu0 %v3317_v59 }
 0xe7c   :  { %2243 = vmatpush.msrb.mxu2 %v3326_v63 }
 0xe7d   :  { %2183 = vmatpush.msra.mxu0 %v3323_v2 }
 0xeef   :  { %v1783_v46 = vpop.f32.mrf.mxu3 }
 0xef0   :  { %v3481_v10 = vadd.f32 %v3415_v53, %v1783_v46 }
 0xef2   :  { %v1786_v52 = vsel %vm405_vm15, %v3481_v10, -inf }
 0xef3   :  { %1787 = vmax.xlane.f32.xlu0 %v1786_v52 }
 0xf66   :  { %v1788_v29 = vpop.xlane.xlu0 %1787 }
 0xf67   :  { %vm1789_vm6 = vcmp.eq.f32.partialorder %v3481_v10, %v1788_v29 }
 0xf68   :  { %v1790_v42 = vsel %vm1789_vm6, %v2816_v3, 32 }
 0xf69   :  { %v1791_v43 = vsel %vm405_vm15, %v1790_v42, 2147483647 }
 0xf6a   :  { %v1793_v44 = vshra.s32 %v1791_v43, 16  ;;  %v1792_v59 = vand.u32 65535, %v1791_v43 }
 0xf6c   :  { %v1795_v58 = vcvt.s32.f32 %v1793_v44  ;;  %v1794_v2 = vcvt.s32.f32 %v1792_v59 }
 0xf6e   :  { %1796 = vmin.xlane.f32.xlu1 %v1795_v58 }
 0xfe1   :  { %v1797_v61 = vpop.xlane.xlu1 %1796 }
 0xfe2   :  { %vm1798_vm7 = vcmp.eq.f32.partialorder %v1795_v58, %v1797_v61  ;;  %v1803_v45 = vcvt.f32.s32 %v1797_v61 }
 0xfe3   :  { %v1799_v63 = vsel %vm1798_vm7, %v1794_v2, inf }
 0xfe4   :  { %1800 = vmin.xlane.f32.xlu2 %v1799_v63  ;;  %v1804_v21 = vshll.u32 %v1803_v45, 16 }
0x1057   :  { %v1801_v25 = vpop.xlane.xlu2 %1800 }
0x1058   :  { %v1802_v40 = vcvt.f32.s32 %v1801_v25 }
0x105a   :  { %v1805_v1 = vadd.s32 %v1804_v21, %v1802_v40 }
0x105c   :  { %vm1806_vm8 = vcmp.eq.s32.totalorder %v2816_v3, %v1805_v1 }
0x105d   :  { %v2474_v56 = vsel %vm1806_vm8, 1.0, %v3602_v0 }
0x105e   :  { %2476 = vmatmul.msk.f32.vlgmr.msra.gmra.mxu1 %vm148_vm2, %v2474_v56  ;;  %2479 = vmatmul.msk.f32.vlgmr.msra.gmra.mxu3 %vm148_vm2, %v2474_v56 }
0x105f   :  { %2097 = vmatpush.msra.mxu1 %v3200_v62  ;;  %2160 = vmatpush.msra.mxu3 %v3203_v49  ;;  %v1826_v62 = vpop.f32.mrf.mxu0 }
0x1061   :  { %2098 = vmatpush.msra.mxu1 %v3206_v4  ;;  %2161 = vmatpush.msra.mxu3 %v3209_v9  ;;  %v3622_v9 = vld [vmem:[#allocation17_spill] sm:$0xff] }
0x1063   :  { %2099 = vmatpush.msra.mxu1 %v3212_v48  ;;  %2162 = vmatpush.msra.mxu3 %v3215_v13  ;;  %v1889_v13 = vpop.f32.mrf.mxu2 }
0x1065   :  { %2100 = vmatpush.msra.mxu1 %v3218_v38  ;;  %2163 = vmatpush.msra.mxu3 %v3221_v39 }
0x1066   :  { %2482 = vmatmul.msk.f32.vlgmr.msrb.gmra.mxu1 %vm148_vm2, %v2474_v56  ;;  %2484 = vmatmul.msk.f32.vlgmr.msrb.gmra.mxu3 %vm148_vm2, %v2474_v56 }
0x1067   :  { %2220 = vmatpush.msrb.mxu1 %v3226_v50  ;;  %2262 = vmatpush.msrb.mxu3 %v3229_v55  ;;  %v3623_v55 = vld [vmem:[#allocation14_spill] sm:$0xff]  ;;  %v1949_v20 = vpop.f32.mrf.mxu0 }
0x1069   :  { %2221 = vmatpush.msrb.mxu1 %v3232_v47  ;;  %2263 = vmatpush.msrb.mxu3 %v3235_v15 }
0x106b   :  { %2222 = vmatpush.msrb.mxu1 %v3238_v7  ;;  %2264 = vmatpush.msrb.mxu3 %v3241_v8  ;;  %v1991_v8 = vpop.f32.mrf.mxu2 }
0x106d   :  { %2223 = vmatpush.msrb.mxu1 %v3244_v11  ;;  %2265 = vmatpush.msrb.mxu3 %v3617_v14  ;;  %v3624_v14 = vld [vmem:[#allocation18_spill] sm:$0xff] }
0x10db   :  { %v1849_v49 = vpop.f32.mrf.mxu1 }
0x10dc   :  { %v1850_v4 = vadd.f32 %v1849_v49, %v1826_v62 }
0x10de   :  { %v1852_v48 = vadd.f32 %v3622_v9, %v1850_v4 }
0x10e0   :  { %v2477_v38 = vmul.f32 -1.442695, %v1852_v48 }
0x10e1   :  { %v1909_v39 = vpop.f32.mrf.mxu3 }
0x10e2   :  { %2602 = vpow2.f32 %v2477_v38  ;;  %v1910_v50 = vadd.f32 %v1909_v39, %v1889_v13 }
0x10e3   :  { %v1969_v5 = vpop.f32.mrf.mxu1 }
0x10e4   :  { %v1912_v47 = vadd.f32 %v3623_v55, %v1910_v50  ;;  %v1970_v30 = vadd.f32 %v1969_v5, %v1949_v20 }
0x10e6   :  { %v2480_v15 = vmul.f32 -1.442695, %v1912_v47  ;;  %v1972_v57 = vadd.f32 %v3625_v27, %v1970_v30 }
0x10e8   :  { %v2603_v7 = vpop.eup %2602  ;;  %2604 = vpow2.f32 %v2480_v15 }
0x10e9   :  { %v1856_v41 = vadd.f32 1.0, %v2603_v7  ;;  %v2011_v11 = vpop.f32.mrf.mxu3 }
0x10ea   :  { %v2012_v51 = vadd.f32 %v2011_v11, %v1991_v8 }
0x10eb   :  { %2606 = vrcp.f32 %v1856_v41  ;;  %v1868_v29 = vand.u32 2147483648, %v1856_v41  ;;  %vm1862_vm10 = vweird.f32 %v1856_v41  ;;  %v1866_v43 = vand.u32 2147483647, %v1856_v41 }
0x10ec   :  { %v2014_v6 = vadd.f32 %v3624_v14, %v2012_v51 }
0x10ed   :  { %v1869_v2 = vor.u32 1.1754944e-38, %v1868_v29  ;;  %vm1867_vm14 = vcmp.eq.f32.partialorder %v1866_v43, 8.507059e+37 }
0x10ee   :  { %v2605_v22 = vpop.eup %2604  ;;  %v2485_v24 = vmul.f32 -1.442695, %v2014_v6 }
0x10ef   :  { %v1916_v26 = vadd.f32 1.0, %v2605_v22 }
0x10f0   :  { %2608 = vpow2.f32 %v2485_v24 }
0x10f1   :  { %v2607_v60 = vpop.eup %2606  ;;  %2610 = vrcp.f32 %v1916_v26  ;;  %v1928_v44 = vand.u32 2147483648, %v1916_v26  ;;  %v1926_v61 = vand.u32 2147483647, %v1916_v26  ;;  %vm1922_vm13 = vweird.f32 %v1916_v26 }
0x10f2   :  { %v1858_v23 = vmul.f32 %v2607_v60, %v1856_v41  ;;  %vm1863_vm9 = vweird.f32 %v2607_v60 }
0x10f3   :  { %vm1864_vm11 = vmor %vm1862_vm10, %vm1863_vm9  ;;  %v1929_v25 = vor.u32 1.1754944e-38, %v1928_v44  ;;  %vm1927_vm1 = vcmp.eq.f32.partialorder %v1926_v61, 8.507059e+37 }
0x10f4   :  { %v1859_v17 = vsub.f32 1.0, %v1858_v23 }
0x10f6   :  { %v2609_v18 = vpop.eup %2608  ;;  %v1860_v31 = vmul.f32 %v2607_v60, %v1859_v17 }
0x10f7   :  { %v2611_v19 = vpop.eup %2610  ;;  %v2018_v54 = vadd.f32 1.0, %v2609_v18 }
0x10f8   :  { %v1918_v46 = vmul.f32 %v2611_v19, %v1916_v26  ;;  %v1861_v52 = vadd.f32 %v2607_v60, %v1860_v31  ;;  %vm1923_vm12 = vweird.f32 %v2611_v19 }
0x10f9   :  { %2612 = vrcp.f32 %v2018_v54  ;;  %vm1924_vm0 = vmor %vm1922_vm13, %vm1923_vm12  ;;  %v2030_v39 = vand.u32 2147483648, %v2018_v54  ;;  %vm2024_vm4 = vweird.f32 %v2018_v54  ;;  %v2028_v47 = vand.u32 2147483647, %v2018_v54 }
0x10fa   :  { %v1919_v42 = vsub.f32 1.0, %v1918_v46  ;;  %2614 = vtanh.f32 %v1972_v57  ;;  %v1865_v59 = vsel %vm1864_vm11, %v2607_v60, %v1861_v52 }
0x10fb   :  { %v1870_v21 = vsel %vm1867_vm14, %v1869_v2, %v1865_v59  ;;  %v2031_v7 = vor.u32 1.1754944e-38, %v2030_v39  ;;  %vm2029_vm6 = vcmp.eq.f32.partialorder %v2028_v47, 8.507059e+37 }
0x10fc   :  { %v1920_v58 = vmul.f32 %v2611_v19, %v1919_v42 }
0x10fe   :  { %v1921_v63 = vadd.f32 %v2611_v19, %v1920_v58 }
0x10ff   :  { %v2613_v45 = vpop.eup %2612 }
0x1100   :  { %v1925_v40 = vsel %vm1924_vm0, %v2611_v19, %v1921_v63  ;;  %v2020_v1 = vmul.f32 %v2613_v45, %v2018_v54  ;;  %v2615_v56 = vpop.eup %2614  ;;  %vm2025_vm3 = vweird.f32 %v2613_v45 }
0x1101   :  { %v1930_v62 = vsel %vm1927_vm1, %v1929_v25, %v1925_v40  ;;  %v2035_v4 = vmul.f32 %v2615_v56, %v1870_v21  ;;  %vm2026_vm5 = vmor %vm2024_vm4, %vm2025_vm3 }
0x1102   :  { %v2034_v49 = vmul.f32 %v1930_v62, %v3452_v16  ;;  %v2021_v48 = vsub.f32 1.0, %v2020_v1 }
0x1104   :  { %v3515_v13 = vadd.f32 %v2035_v4, %v2034_v49  ;;  %v2022_v38 = vmul.f32 %v2613_v45, %v2021_v48 }
0x1106   :  { %2616 = vtanh.f32 %v3515_v13  ;;  %v2023_v50 = vadd.f32 %v2613_v45, %v2022_v38 }
0x1108   :  { %v2027_v15 = vsel %vm2026_vm5, %v2613_v45, %v2023_v50 }
0x1109   :  { %v2032_v41 = vsel %vm2029_vm6, %v2031_v7, %v2027_v15 }
0x110c   :  { %v2617_v8 = vpop.eup %2616 }
0x110d   :  { %v2038_v11 = vmul.f32 %v2617_v8, %v2032_v41 }
0x110f   :  { %2486 = vmatmul.msk.f32.vlgmr.msrb.gmra.mxu0 %vm148_vm2, %v2038_v11  ;;  %2488 = vmatmul.msk.f32.vlgmr.msra.gmra.mxu1 %vm148_vm2, %v2038_v11 }
0x1110   :  { %2491 = vmatmul.msk.f32.vlgmr.msra.gmra.mxu3 %vm148_vm2, %v2038_v11  ;;  %2282 = vmatpush.msrb.mxu0 %v3261_v28 }
0x1111   :  { %2330 = vmatpush.msra.mxu1 %v3267_v32 }
0x1112   :  { %2283 = vmatpush.msrb.mxu0 %v3271_v33 }
0x1113   :  { %2331 = vmatpush.msra.mxu1 %v3277_v34 }
0x1114   :  { %2284 = vmatpush.msrb.mxu0 %v3281_v12 }
0x1115   :  { %2332 = vmatpush.msra.mxu1 %v3287_v35 }
0x1116   :  { %2285 = vmatpush.msrb.mxu0 %v3291_v36 }
0x1117   :  { %2494 = vmatmul.msk.f32.vlgmr.msrb.gmra.mxu1 %vm148_vm2, %v2038_v11 }
0x1118   :  { %2496 = vmatmul.msk.f32.vlgmr.msrb.gmra.mxu3 %vm148_vm2, %v2038_v11  ;;  %2333 = vmatpush.msra.mxu1 %v3302_v37 }
0x118c   :  { %v2059_v16 = vpop.f32.mrf.mxu0  ;;  %v2102_v57 = vpop.f32.mrf.mxu1 }
0x118d   :  { %v3532_v28 = vadd.f32 %v3415_v53, %v2059_v16 }
0x118f   :  { %v2062_v32 = vsel %vm405_vm15, %v3532_v28, -inf }
0x1190   :  { %2063 = vmax.xlane.f32.xlu0 %v2062_v32 }
0x1193   :  { %v2165_v30 = vpop.f32.mrf.mxu3 }
0x1194   :  { %v2225_v21 = vpop.f32.mrf.mxu1 }
0x119b   :  { %v2267_v46 = vpop.f32.mrf.mxu3 }
0x1203   :  { %v2064_v33 = vpop.xlane.xlu0 %2063 }
0x1204   :  { %vm2065_vm7 = vcmp.eq.f32.partialorder %v3532_v28, %v2064_v33 }
0x1205   :  { %v2066_v34 = vsel %vm2065_vm7, %v2816_v3, 32  ;;  %vm2359_vm7 = vcmask 1040384  }
0x1206   :  { %v2067_v12 = vsel %vm405_vm15, %v2066_v34, 2147483647 }
0x1207   :  { %v2069_v35 = vshra.s32 %v2067_v12, 16  ;;  %v2068_v51 = vand.u32 65535, %v2067_v12 }
0x1209   :  { %v2071_v36 = vcvt.s32.f32 %v2069_v35  ;;  %v2070_v6 = vcvt.s32.f32 %v2068_v51 }
0x120b   :  { %2072 = vmin.xlane.f32.xlu1 %v2071_v36 }
0x127e   :  { %v2073_v37 = vpop.xlane.xlu1 %2072 }
0x127f   :  { %vm2074_vm8 = vcmp.eq.f32.partialorder %v2071_v36, %v2073_v37  ;;  %v2079_v24 = vcvt.f32.s32 %v2073_v37 }
0x1280   :  { %v2075_v22 = vsel %vm2074_vm8, %v2070_v6, inf  ;;  %vm2361_vm8 = vcmask 1041408  }
0x1281   :  { %2076 = vmin.xlane.f32.xlu2 %v2075_v22  ;;  %v2080_v5 = vshll.u32 %v2079_v24, 16 }
0x12f4   :  { %v2077_v26 = vpop.xlane.xlu2 %2076 }
0x12f5   :  { %v2078_v60 = vcvt.f32.s32 %v2077_v26 }
0x12f7   :  { %v2081_v20 = vadd.s32 %v2080_v5, %v2078_v60 }
0x12f9   :  { %vm2082_vm9 = vcmp.eq.s32.totalorder %v2816_v3, %v2081_v20 }
0x12fa   :  { %v2487_v23 = vsel %vm2082_vm9, 1.0, %v3602_v0  ;;  %vm2363_vm9 = vcmask 1042432  }
0x12fb   :  { %2489 = vmatmul.msk.f32.vlgmr.msra.gmra.mxu2 %vm148_vm2, %v2487_v23  ;;  %2492 = vmatmul.msk.f32.vlgmr.msra.gmra.mxu0 %vm148_vm2, %v2487_v23 }
0x1303   :  { %2495 = vmatmul.msk.f32.vlgmr.msrb.gmra.mxu2 %vm148_vm2, %v2487_v23  ;;  %2497 = vmatmul.msk.f32.vlgmr.msrb.gmra.mxu0 %vm148_vm2, %v2487_v23 }
0x1378   :  { %v2185_v17 = vpop.f32.mrf.mxu0 }
0x1379   :  { %v2186_v18 = vadd.f32 %v2185_v17, %v2165_v30  ;;  %v3626_v17 = vld [vmem:[#allocation16_spill] sm:$0xff] }
0x137b   :  { %v2188_v31 = vadd.f32 %v3623_v55, %v2186_v18  ;;  %v2339_v18 = vrot.slane %v3626_v17, 7 }
0x137d   :  { %v2493_v19 = vmul.f32 -1.442695, %v2188_v31 }
0x137e   :  { %v2125_v54 = vpop.f32.mrf.mxu2 }
0x137f   :  { %2618 = vpow2.f32 %v2493_v19  ;;  %v2126_v3 = vadd.f32 %v2125_v54, %v2102_v57  ;;  %v3628_v19 = vld [vmem:[#allocation13_spill] sm:$0xff]  ;;  %v3629_v54 = vld [vmem:[#allocation20_spill] sm:$0xff] }
0x1380   :  { %v2287_v0 = vpop.f32.mrf.mxu0  ;;  %v2345_v57 = vrot.slane %v3628_v19, 5 }
0x1381   :  { %v2128_v52 = vadd.f32 %v3622_v9, %v2126_v3  ;;  %v2288_v29 = vadd.f32 %v2287_v0, %v2267_v46  ;;  %v2348_v3 = vrot.slane %v3629_v54, 4  ;;  %v3630_v46 = vld [vmem:[#allocation15_spill] sm:$0xff] }
0x1382   :  { %v2360_v0 = vsel %vm2359_vm7, %v3630_v46, %v2339_v18 }
0x1383   :  { %v2490_v42 = vmul.f32 -1.442695, %v2128_v52  ;;  %v2290_v43 = vadd.f32 %v3624_v14, %v2288_v29  ;;  %v2351_v52 = vrot.slane %v3481_v10, 3 }
0x1385   :  { %v2619_v44 = vpop.eup %2618  ;;  %2620 = vpow2.f32 %v2490_v42  ;;  %v2498_v58 = vmul.f32 -1.442695, %v2290_v43  ;;  %v2354_v42 = vrot.slane %v3532_v28, 2 }
0x1386   :  { %v2192_v59 = vadd.f32 1.0, %v2619_v44  ;;  %v2245_v63 = vpop.f32.mrf.mxu2 }
0x1387   :  { %2622 = vpow2.f32 %v2498_v58  ;;  %v2246_v9 = vadd.f32 %v2245_v63, %v2225_v21 }
0x1388   :  { %2624 = vrcp.f32 %v2192_v59  ;;  %v2204_v38 = vand.u32 2147483648, %v2192_v59  ;;  %vm2198_vm10 = vweird.f32 %v2192_v59  ;;  %v2202_v47 = vand.u32 2147483647, %v2192_v59 }
0x1389   :  { %v2248_v62 = vadd.f32 %v3625_v27, %v2246_v9 }
0x138a   :  { %v2205_v11 = vor.u32 1.1754944e-38, %v2204_v38  ;;  %vm2203_vm14 = vcmp.eq.f32.partialorder %v2202_v47, 8.507059e+37 }
0x138b   :  { %v2621_v55 = vpop.eup %2620 }
0x138c   :  { %v2132_v61 = vadd.f32 1.0, %v2621_v55 }
0x138d   :  { %v2623_v2 = vpop.eup %2622 }
0x138e   :  { %v2625_v45 = vpop.eup %2624  ;;  %2626 = vrcp.f32 %v2132_v61  ;;  %v2294_v25 = vadd.f32 1.0, %v2623_v2  ;;  %v2144_v15 = vand.u32 2147483648, %v2132_v61  ;;  %v2142_v8 = vand.u32 2147483647, %v2132_v61 }
0x138f   :  { %v2194_v40 = vmul.f32 %v2625_v45, %v2192_v59  ;;  %vm2199_vm15 = vweird.f32 %v2625_v45  ;;  %vm2138_vm13 = vweird.f32 %v2132_v61 }
0x1390   :  { %2628 = vrcp.f32 %v2294_v25  ;;  %vm2200_vm11 = vmor %vm2198_vm10, %vm2199_vm15  ;;  %v2145_v27 = vor.u32 1.1754944e-38, %v2144_v15  ;;  %vm2143_vm1 = vcmp.eq.f32.partialorder %v2142_v8, 8.507059e+37  ;;  %v2306_v24 = vand.u32 2147483648, %v2294_v25 }
0x1391   :  { %v2195_v1 = vsub.f32 1.0, %v2194_v40  ;;  %2630 = vtanh.f32 %v2248_v62  ;;  %vm2300_vm4 = vweird.f32 %v2294_v25  ;;  %v2304_v26 = vand.u32 2147483647, %v2294_v25 }
0x1392   :  { %v2307_v60 = vor.u32 1.1754944e-38, %v2306_v24  ;;  %vm2365_vm15 = vcmask 1043456   ;;  %vm2367_vm10 = vcmask 1044480  }
0x1393   :  { %v2196_v56 = vmul.f32 %v2625_v45, %v2195_v1  ;;  %vm2305_vm6 = vcmp.eq.f32.partialorder %v2304_v26, 8.507059e+37 }
0x1394   :  { %v2627_v14 = vpop.eup %2626 }
0x1395   :  { %v2134_v49 = vmul.f32 %v2627_v14, %v2132_v61  ;;  %v2197_v4 = vadd.f32 %v2625_v45, %v2196_v56  ;;  %vm2139_vm12 = vweird.f32 %v2627_v14 }
0x1396   :  { %v2629_v48 = vpop.eup %2628  ;;  %vm2140_vm0 = vmor %vm2138_vm13, %vm2139_vm12  ;;  %vm2371_vm12 = vcmask 1046528  }
0x1397   :  { %v2135_v39 = vsub.f32 1.0, %v2134_v49  ;;  %v2296_v50 = vmul.f32 %v2629_v48, %v2294_v25  ;;  %v2201_v41 = vsel %vm2200_vm11, %v2625_v45, %v2197_v4  ;;  %v2631_v12 = vpop.eup %2630  ;;  %vm2301_vm3 = vweird.f32 %v2629_v48 }
0x1398   :  { %v2206_v33 = vsel %vm2203_vm14, %v2205_v11, %v2201_v41  ;;  %vm2302_vm5 = vmor %vm2300_vm4, %vm2301_vm3  ;;  %vm2369_vm11 = vcmask 1045504  }
0x1399   :  { %v2136_v7 = vmul.f32 %v2627_v14, %v2135_v39  ;;  %v2297_v16 = vsub.f32 1.0, %v2296_v50  ;;  %v2310_v51 = vmul.f32 %v2206_v33, %v3515_v13  ;;  %v3627_v13 = vld [vmem:[#allocation11_spill] sm:$0xff] }
0x139a   :  { %v2342_v31 = vrot.slane %v3627_v13, 6 }
0x139b   :  { %v2137_v32 = vadd.f32 %v2627_v14, %v2136_v7  ;;  %v2298_v35 = vmul.f32 %v2629_v48, %v2297_v16 }
0x139c   :  { %v2362_v29 = vsel %vm2361_vm8, %v2360_v0, %v2342_v31 }
0x139d   :  { %v2141_v34 = vsel %vm2140_vm0, %v2627_v14, %v2137_v32  ;;  %v2299_v22 = vadd.f32 %v2629_v48, %v2298_v35  ;;  %v2364_v44 = vsel %vm2363_vm9, %v2362_v29, %v2345_v57 }
0x139e   :  { %v2146_v36 = vsel %vm2143_vm1, %v2145_v27, %v2141_v34  ;;  %v2366_v59 = vsel %vm2365_vm15, %v2364_v44, %v2348_v3 }
0x139f   :  { %v2311_v37 = vmul.f32 %v2631_v12, %v2146_v36  ;;  %v2303_v5 = vsel %vm2302_vm5, %v2629_v48, %v2299_v22  ;;  %v2368_v55 = vsel %vm2367_vm10, %v2366_v59, %v2351_v52 }
0x13a0   :  { %v2308_v23 = vsel %vm2305_vm6, %v2307_v60, %v2303_v5  ;;  %v2370_v10 = vsel %vm2369_vm11, %v2368_v55, %v2354_v42 }
0x13a1   :  { %v2312_v6 = vadd.f32 %v2311_v37, %v2310_v51 }
0x13a3   :  { %2632 = vtanh.f32 %v2312_v6 }
0x13a9   :  { %v2633_v20 = vpop.eup %2632 }
0x13aa   :  { %v2314_v30 = vmul.f32 %v2633_v20, %v2308_v23 }
0x13ac   :  { %2499 = vmatmul.msk.f32.vlgmr.msra.gmra.mxu1 %vm148_vm2, %v2314_v30 }
0x1429   :  { %v2335_v43 = vpop.f32.mrf.mxu1 }
0x142a   :  { %v2336_v58 = vadd.f32 %v3415_v53, %v2335_v43 }
0x142c   :  { %v2357_v61 = vrot.slane %v2336_v58, 1 }
0x142e   :  { %v2372_v2 = vsel %vm2371_vm12, %v2370_v10, %v2357_v61 }
0x142f   :  { %2373 = vst.msk [vmem:[#allocation7] sm:$0xff] %vm148_vm2, %v2372_v2 }
0x1430   :  { %2384 = dma.vmem_to_hbm [thread:$0]  %s2380_s11, 128, %s2382_s14, [#allocation4]  }
0x1431   :  { %2751 = dma.done.wait [#allocation4], 128  }
0x1432   :  { %2752 = vsyncadd [#allocation4], 4294967168 }
0x1433   :  { %2389 = vsyncpa [#allocation3], 1 }
0x1434   :  { %2390 = vsyncpa [#allocation6], 1 }
0x1435   :  { %2391 = vsyncpa [#allocation4], 1 }

</bundles_post_ra>
